<compile_context>
chip_gen: v6e
topology: v6e:2x2x1
jax: 0.10.0
libtpu: 0.0.40
codegen_flags: <defaults>
</compile_context>

<pallas_src>
import functools

import jax
import jax.numpy as jnp
import numpy as np
from jax.experimental import pallas as pl
from jax.experimental.pallas import tpu as pltpu


# ----------------------------------------------------------------------------
# Kernels
# ----------------------------------------------------------------------------
def linear_kernel(x_ref, w_ref, b_ref, o_ref):
    # (B, K) @ (K, N) + (1, N); N = clip_length * D = 128 -> lane-dense output.
    o_ref[...] = (
        jnp.dot(x_ref[...], w_ref[...], preferred_element_type=jnp.float32)
        + b_ref[...]
    )


def layers_kernel(
    h0_ref,            # (T, D)   initial activations (clip tokens + prefix const), T = B*S
    mask_ref,          # (T, T)   additive block-diagonal mask (0 within example, -1e30 across)
    g1_ref, b1_ref,    # (1, 1, D)       LayerNorm 1
    wq_ref,            # (1, H, D, hd)   per-head query weights
    wk_ref,            # (1, H, D, hd)   per-head key weights   (from wkv[:, :D])
    wv_ref,            # (1, H, D, hd)   per-head value weights (from wkv[:, D:])
    wp_ref,            # (1, H, hd, D)   per-head output-projection weights
    bp_ref,            # (1, 1, D)
    g2_ref, b2_ref,    # (1, 1, D)       LayerNorm 2
    w1_ref, b1m_ref,   # (1, D, Hm), (1, 1, Hm)   mlp fc1
    w2_ref, b2m_ref,   # (1, Hm, D), (1, 1, D)    mlp fc2
    o_ref,             # (T, D)   output (resident block, written back once)
    h_ref,             # (T, D)   VMEM scratch: activations carried across layers
    *, num_heads, head_dim,
):
    layer = pl.program_id(0)

    @pl.when(layer == 0)
    def _():
        h_ref[...] = h0_ref[...]

    x = h_ref[...]                         # (T, D)
    T, D = x.shape
    H = num_heads
    scale = head_dim ** -0.5

    def layer_norm(v, g, b):
        mu = jnp.mean(v, axis=-1, keepdims=True)
        var = jnp.mean(jnp.square(v - mu), axis=-1, keepdims=True)
        return (v - mu) * jax.lax.rsqrt(var + 1e-5) * g + b

    # --- multi-head self-attention (heads as leading MXU batch dim, no lane slicing) ---
    hn = layer_norm(x, g1_ref[0], b1_ref[0])                       # (T, D)
    hb = jnp.broadcast_to(hn[None], (H, T, D))                     # hoisted once, reused 3x
    q = jnp.einsum("htd,hdk->htk", hb, wq_ref[0],
                   preferred_element_type=jnp.float32)             # (H, T, hd)
    k = jnp.einsum("htd,hdk->htk", hb, wk_ref[0],
                   preferred_element_type=jnp.float32)             # (H, T, hd)
    v = jnp.einsum("htd,hdk->htk", hb, wv_ref[0],
                   preferred_element_type=jnp.float32)             # (H, T, hd)

    att = jnp.einsum("htd,hud->htu", q, k,
                     preferred_element_type=jnp.float32) * scale   # (H, T, T)
    att = att + mask_ref[...]                                      # block-diagonal mask
    att = att - jnp.max(att, axis=-1, keepdims=True)
    e = jnp.exp(att)
    # NOTE: exact divide kept so the f32 validation stays tight; pl.reciprocal(approx=True)
    # is a free EUP-slot win once S is large.
    p = e / jnp.sum(e, axis=-1, keepdims=True)

    ctx = jnp.einsum("htu,hud->htd", p, v,
                     preferred_element_type=jnp.float32)           # (H, T, hd)
    # head concat + projection folded into per-head projections summed over heads
    proj = jnp.einsum("htd,hdk->htk", ctx, wp_ref[0],
                      preferred_element_type=jnp.float32)          # (H, T, D)
    x = x + jnp.sum(proj, axis=0) + bp_ref[0]

    # --- MLP ---
    h2 = layer_norm(x, g2_ref[0], b2_ref[0])
    m = jnp.dot(h2, w1_ref[0], preferred_element_type=jnp.float32) + b1m_ref[0]
    m = jnp.maximum(m, 0.0)                                        # relu
    m = jnp.dot(m, w2_ref[0], preferred_element_type=jnp.float32) + b2m_ref[0]
    x = x + m

    h_ref[...] = x
    o_ref[...] = x


# ----------------------------------------------------------------------------
# Wrappers around pallas_call
# ----------------------------------------------------------------------------
def pallas_linear(x, w, b):
    B = x.shape[0]
    N = w.shape[1]
    return pl.pallas_call(
        linear_kernel,
        out_shape=jax.ShapeDtypeStruct((B, N), jnp.float32),
    )(x, w, b)


def pallas_transformer_layers(h0, mask, kp, num_heads):
    T, D = h0.shape
    L, H, _, hd = kp["wq_h"].shape
    Hm = kp["w1"].shape[-1]

    kernel = functools.partial(layers_kernel, num_heads=H, head_dim=hd)

    def per_layer(*shape):
        nd = len(shape)
        return pl.BlockSpec((1,) + tuple(shape),
                            lambda l, nd=nd: (l,) + (0,) * nd)

    def whole(shape):
        return pl.BlockSpec(shape, lambda l, n=len(shape): (0,) * n)

    return pl.pallas_call(
        kernel,
        grid=(L,),
        in_specs=[
            whole((T, D)),                                             # h0
            whole((T, T)),                                             # mask
            per_layer(1, D), per_layer(1, D),                          # g1, b1
            per_layer(H, D, hd), per_layer(H, D, hd), per_layer(H, D, hd),  # wq, wk, wv
            per_layer(H, hd, D), per_layer(1, D),                      # wp, bp
            per_layer(1, D), per_layer(1, D),                          # g2, b2
            per_layer(D, Hm), per_layer(1, Hm),                        # w1, b1m
            per_layer(Hm, D), per_layer(1, D),                         # w2, b2m
        ],
        out_specs=pl.BlockSpec((T, D), lambda l: (0, 0)),
        out_shape=jax.ShapeDtypeStruct((T, D), jnp.float32),
        scratch_shapes=[pltpu.VMEM((T, D), jnp.float32)],
        compiler_params=pltpu.CompilerParams(
            dimension_semantics=("arbitrary",)),   # layers carry state -> sequential
    )(
        h0, mask,
        kp["g1"], kp["b1"],
        kp["wq_h"], kp["wk_h"], kp["wv_h"], kp["wp_h"], kp["bp"],
        kp["g2"], kp["b2"],
        kp["w1"], kp["b1m"], kp["w2"], kp["b2m"],
    )


def prepare_kernel_params(params, num_heads):
    """Stack per-layer weights on a leading L axis and pre-split heads (wrapper-side)."""
    layers = params["layers"]
    D = layers[0]["wq"].shape[0]
    assert D % num_heads == 0, "dim_embedding must be divisible by num_heads"
    hd = D // num_heads

    def heads_out(w):                     # (D_in, D) -> (H, D_in, hd)
        return w.reshape(w.shape[0], num_heads, hd).transpose(1, 0, 2)

    def stack(fn):
        return jnp.stack([fn(l) for l in layers], axis=0)

    return {
        "g1":  stack(lambda l: l["g1"]),                              # (L, 1, D)
        "b1":  stack(lambda l: l["b1"]),
        "wq_h": stack(lambda l: heads_out(l["wq"])),                  # (L, H, D, hd)
        "wk_h": stack(lambda l: heads_out(l["wkv"][:, :D])),          # split wkv -> K
        "wv_h": stack(lambda l: heads_out(l["wkv"][:, D:])),          # split wkv -> V
        "wp_h": stack(lambda l: l["wp"].reshape(num_heads, hd, D)),   # (L, H, hd, D)
        "bp":  stack(lambda l: l["bp"]),
        "g2":  stack(lambda l: l["g2"]),
        "b2":  stack(lambda l: l["b2"]),
        "w1":  stack(lambda l: l["w1"]),                              # (L, D, Hm)
        "b1m": stack(lambda l: l["b1m"]),                             # (L, 1, Hm)
        "w2":  stack(lambda l: l["w2"]),                              # (L, Hm, D)
        "b2m": stack(lambda l: l["b2m"]),
    }


def transformer_mapper_forward(x, params, clip_length, num_heads):
    """Pallas implementation of TransformerMapper.forward."""
    B = x.shape[0]
    P, D = params["prefix_const"].shape
    S = clip_length + P
    T = B * S

    kp = prepare_kernel_params(params, num_heads)

    # x = self.linear(x).view(B, clip_length, D)
    y = pallas_linear(x, params["linear_w"], params["linear_b"])      # (B, clip_length*D)
    seq = y.reshape(B, clip_length, D)

    # prefix = cat(seq, prefix_const.expand(B, ...)); flatten batch into rows
    prefix = jnp.broadcast_to(params["prefix_const"][None], (B, P, D))
    h0 = jnp.concatenate([seq, prefix], axis=1).reshape(T, D)

    # additive block-diagonal mask: token t only attends within its own example
    ex = jnp.arange(T, dtype=jnp.int32) // S
    mask = jnp.where(ex[:, None] == ex[None, :], 0.0, -1e30).astype(jnp.float32)

    h = pallas_transformer_layers(h0, mask, kp, num_heads)            # (T, D)

    # out = transformer(prefix)[:, clip_length:]
    return h.reshape(B, S, D)[:, clip_length:]
    # TODO(synk): the initial linear + concat could be fused into the l==0 grid step of the
    # layers kernel, but that needs an in-kernel lane->sublane relayout; kept in JAX.


# ----------------------------------------------------------------------------
# Pure-JAX reference (mirrors the PyTorch module) for validation
# ----------------------------------------------------------------------------
def reference_forward(x, params, clip_length, num_heads):
    B = x.shape[0]
    D = params["prefix_const"].shape[1]
    hd = D // num_heads

    def ln(v, g, b):
        mu = jnp.mean(v, axis=-1, keepdims=True)
        var = jnp.mean(jnp.square(v - mu), axis=-1, keepdims=True)
        return (v - mu) * jax.lax.rsqrt(var + 1e-5) * g + b

    y = x @ params["linear_w"] + params["linear_b"]
    seq = y.reshape(B, clip_length, D)
    prefix = jnp.broadcast_to(params["prefix_const"][None], (B,) + params["prefix_const"].shape)
    h = jnp.concatenate([seq, prefix], axis=1)

    for lp in params["layers"]:
        n = ln(h, lp["g1"], lp["b1"])
        q = n @ lp["wq"]
        kv = n @ lp["wkv"]
        k, v = kv[..., :D], kv[..., D:]
        B_, S_, _ = q.shape
        qh = q.reshape(B_, S_, num_heads, hd)
        kh = k.reshape(B_, S_, num_heads, hd)
        vh = v.reshape(B_, S_, num_heads, hd)
        att = jnp.einsum("bnhd,bmhd->bnmh", qh, kh) * (hd ** -0.5)
        att = jax.nn.softmax(att, axis=2)
        out = jnp.einsum("bnmh,bmhd->bnhd", att, vh).reshape(B_, S_, D)
        out = out @ lp["wp"] + lp["bp"]
        h = h + out
        n2 = ln(h, lp["g2"], lp["b2"])
        m = jnp.maximum(n2 @ lp["w1"] + lp["b1m"], 0.0) @ lp["w2"] + lp["b2m"]
        h = h + m

    return h[:, clip_length:]


# ----------------------------------------------------------------------------
# Deterministic parameter construction
# ----------------------------------------------------------------------------
def make_params(key, dim_clip, dim_embedding, prefix_length, clip_length,
                num_layers, mlp_ratio=2.0):
    D = dim_embedding
    Hm = int(D * mlp_ratio)
    keys = jax.random.split(key, 3 + num_layers)

    def w(k, shape, scale=0.02):
        return (scale * jax.random.normal(k, shape)).astype(jnp.float32)

    params = {
        "linear_w": w(keys[0], (dim_clip, clip_length * D)),
        "linear_b": w(keys[1], (1, clip_length * D)),
        "prefix_const": jax.random.normal(keys[2], (prefix_length, D)).astype(jnp.float32),
        "layers": [],
    }
    for i in range(num_layers):
        lk = jax.random.split(keys[3 + i], 8)
        params["layers"].append({
            "g1": jnp.ones((1, D), jnp.float32),
            "b1": jnp.zeros((1, D), jnp.float32),
            "wq": w(lk[0], (D, D)),          # to_queries, bias=False
            "wkv": w(lk[1], (D, 2 * D)),     # to_keys_values, bias=False
            "wp": w(lk[2], (D, D)),          # project
            "bp": w(lk[3], (1, D)),
            "g2": jnp.ones((1, D), jnp.float32),
            "b2": jnp.zeros((1, D), jnp.float32),
            "w1": w(lk[4], (D, Hm)),         # mlp fc1
            "b1m": w(lk[5], (1, Hm)),
            "w2": w(lk[6], (Hm, D)),         # mlp fc2
            "b2m": w(lk[7], (1, D)),
        })
    return params


# ----------------------------------------------------------------------------
if __name__ == "__main__":
    # Small shapes consistent with TransformerMapper:
    #   dim_clip=64, dim_embedding=32, prefix_length=4, clip_length=4,
    #   num_layers=2 (module default is 8; kept small), num_heads=8 (fixed by module)
    batch = 2
    dim_clip = 64
    dim_embedding = 32
    prefix_length = 4
    clip_length = 4
    num_layers = 2
    num_heads = 8

    key = jax.random.PRNGKey(0)
    kx, kp = jax.random.split(key)
    x = jax.random.normal(kx, (batch, dim_clip), dtype=jnp.float32)
    params = make_params(kp, dim_clip, dim_embedding, prefix_length,
                         clip_length, num_layers)

    fwd = jax.jit(functools.partial(transformer_mapper_forward,
                                    clip_length=clip_length, num_heads=num_heads))
    out = jax.block_until_ready(fwd(x, params))

    ref = jax.block_until_ready(
        reference_forward(x, params, clip_length, num_heads))

    assert out.shape == (batch, prefix_length, dim_embedding), out.shape
    np.testing.assert_allclose(np.asarray(out), np.asarray(ref), rtol=1e-3, atol=1e-3)

    print("KERNEL_OK")
</pallas_src>

<mosaic_0001>
module attributes {stable_mosaic.version = 11 : i64} {
  func.func @linear_kernel(%arg0: memref<2x64xf32, #tpu.memory_space<vmem>>, %arg1: memref<64x128xf32, #tpu.memory_space<vmem>>, %arg2: memref<1x128xf32, #tpu.memory_space<vmem>>, %arg3: memref<2x128xf32, #tpu.memory_space<vmem>>) attributes {dimension_semantics = [], scalar_prefetch = 0 : i64, scratch_operands = 0 : i64, tpu.core_type = #tpu.core_type<tc>} {
    %c0 = arith.constant 0 : index
    %c0_0 = arith.constant 0 : index
    %0 = vector.load %arg0[%c0, %c0_0] : memref<2x64xf32, #tpu.memory_space<vmem>>, vector<2x64xf32>
    %c0_1 = arith.constant 0 : index
    %c0_2 = arith.constant 0 : index
    %1 = vector.load %arg1[%c0_1, %c0_2] : memref<64x128xf32, #tpu.memory_space<vmem>>, vector<64x128xf32>
    %cst = arith.constant dense<0.000000e+00> : vector<2x128xf32>
    %2 = tpu.matmul %0, %1, %cst {dimension_numbers = #tpu.dot_dimension_numbers<[1], [0], [0], [1], [0, 0, 1, 1], [], []>} : vector<2x64xf32>, vector<64x128xf32>, vector<2x128xf32> -> vector<2x128xf32>
    %c0_3 = arith.constant 0 : index
    %c0_4 = arith.constant 0 : index
    %3 = vector.load %arg2[%c0_3, %c0_4] : memref<1x128xf32, #tpu.memory_space<vmem>>, vector<1x128xf32>
    %4 = vector.broadcast %3 : vector<1x128xf32> to vector<2x128xf32>
    %5 = arith.addf %2, %4 : vector<2x128xf32>
    %c0_5 = arith.constant 0 : index
    %c0_6 = arith.constant 0 : index
    %6 = vector.load %arg3[%c0_5, %c0_6] : memref<2x128xf32, #tpu.memory_space<vmem>>, vector<2x128xf32>
    tpu.vector_store %arg3[%c0_5, %c0_6], %5 {strides = array<i32>} : memref<2x128xf32, #tpu.memory_space<vmem>>, vector<2x128xf32>,
    return
  }
}

module attributes {stable_mosaic.version = 11 : i64} {
  func.func @layers_kernel(%arg0: i32, %arg1: memref<16x32xf32, #tpu.memory_space<vmem>>, %arg2: memref<16x16xf32, #tpu.memory_space<vmem>>, %arg3: memref<1x1x32xf32, #tpu.memory_space<vmem>>, %arg4: memref<1x1x32xf32, #tpu.memory_space<vmem>>, %arg5: memref<1x8x32x4xf32, #tpu.memory_space<vmem>>, %arg6: memref<1x8x32x4xf32, #tpu.memory_space<vmem>>, %arg7: memref<1x8x32x4xf32, #tpu.memory_space<vmem>>, %arg8: memref<1x8x4x32xf32, #tpu.memory_space<vmem>>, %arg9: memref<1x1x32xf32, #tpu.memory_space<vmem>>, %arg10: memref<1x1x32xf32, #tpu.memory_space<vmem>>, %arg11: memref<1x1x32xf32, #tpu.memory_space<vmem>>, %arg12: memref<1x32x64xf32, #tpu.memory_space<vmem>>, %arg13: memref<1x1x64xf32, #tpu.memory_space<vmem>>, %arg14: memref<1x64x32xf32, #tpu.memory_space<vmem>>, %arg15: memref<1x1x32xf32, #tpu.memory_space<vmem>>, %arg16: memref<16x32xf32, #tpu.memory_space<vmem>>, %arg17: memref<16x32xf32, #tpu.memory_space<vmem>>) attributes {dimension_semantics = [#tpu.dimension_semantics<arbitrary>], iteration_bounds = array<i64: 2>, scalar_prefetch = 0 : i64, scratch_operands = 1 : i64, tpu.core_type = #tpu.core_type<tc>, window_params = [{pipeline_mode = #tpu.pipeline_mode<synchronous>, transform_indices = @transform_0, window_bounds = array<i64: 16, 32>}, {pipeline_mode = #tpu.pipeline_mode<synchronous>, transform_indices = @transform_1, window_bounds = array<i64: 16, 16>}, {transform_indices = @transform_2, window_bounds = array<i64: 1, 1, 32>}, {transform_indices = @transform_3, window_bounds = array<i64: 1, 1, 32>}, {transform_indices = @transform_4, window_bounds = array<i64: 1, 8, 32, 4>}, {transform_indices = @transform_5, window_bounds = array<i64: 1, 8, 32, 4>}, {transform_indices = @transform_6, window_bounds = array<i64: 1, 8, 32, 4>}, {transform_indices = @transform_7, window_bounds = array<i64: 1, 8, 4, 32>}, {transform_indices = @transform_8, window_bounds = array<i64: 1, 1, 32>}, {transform_indices = @transform_9, window_bounds = array<i64: 1, 1, 32>}, {transform_indices = @transform_10, window_bounds = array<i64: 1, 1, 32>}, {transform_indices = @transform_11, window_bounds = array<i64: 1, 32, 64>}, {transform_indices = @transform_12, window_bounds = array<i64: 1, 1, 64>}, {transform_indices = @transform_13, window_bounds = array<i64: 1, 64, 32>}, {transform_indices = @transform_14, window_bounds = array<i64: 1, 1, 32>}, {pipeline_mode = #tpu.pipeline_mode<synchronous>, transform_indices = @transform_15, window_bounds = array<i64: 16, 32>}]} {
    %c0_i32 = arith.constant 0 : i32
    %0 = arith.cmpi eq, %arg0, %c0_i32 : i32
    %1 = arith.extui %0 : i1 to i32
    %c0_i32_0 = arith.constant 0 : i32
    %2 = arith.cmpi ne, %1, %c0_i32_0 : i32
    scf.if %2 {
      %c0_73 = arith.constant 0 : index
      %c0_74 = arith.constant 0 : index
      %113 = vector.load %arg1[%c0_73, %c0_74] : memref<16x32xf32, #tpu.memory_space<vmem>>, vector<16x32xf32>
      %c0_75 = arith.constant 0 : index
      %c0_76 = arith.constant 0 : index
      %114 = vector.load %arg17[%c0_75, %c0_76] : memref<16x32xf32, #tpu.memory_space<vmem>>, vector<16x32xf32>
      tpu.vector_store %arg17[%c0_75, %c0_76], %113 {strides = array<i32>} : memref<16x32xf32, #tpu.memory_space<vmem>>, vector<16x32xf32>,
    } else {
    }
    %c0 = arith.constant 0 : index
    %c0_1 = arith.constant 0 : index
    %3 = vector.load %arg17[%c0, %c0_1] : memref<16x32xf32, #tpu.memory_space<vmem>>, vector<16x32xf32>
    %c0_2 = arith.constant 0 : index
    %c0_3 = arith.constant 0 : index
    %c0_4 = arith.constant 0 : index
    %4 = vector.load %arg3[%c0_2, %c0_3, %c0_4] : memref<1x1x32xf32, #tpu.memory_space<vmem>>, vector<1x1x32xf32>
    %5 = vector.shape_cast %4 : vector<1x1x32xf32> to vector<1x32xf32>
    %c0_5 = arith.constant 0 : index
    %c0_6 = arith.constant 0 : index
    %c0_7 = arith.constant 0 : index
    %6 = vector.load %arg4[%c0_5, %c0_6, %c0_7] : memref<1x1x32xf32, #tpu.memory_space<vmem>>, vector<1x1x32xf32>
    %7 = vector.shape_cast %6 : vector<1x1x32xf32> to vector<1x32xf32>
    %cst = arith.constant dense<0.000000e+00> : vector<16xf32>
    %8 = vector.multi_reduction <add>, %3, %cst [1] : vector<16x32xf32> to vector<16xf32>
    %9 = vector.shape_cast %8 : vector<16xf32> to vector<16x1xf32>
    %cst_8 = arith.constant 3.200000e+01 : f32
    %10 = vector.broadcast %cst_8 : f32 to vector<16x1xf32>
    %11 = arith.divf %9, %10 : vector<16x1xf32>
    %12 = vector.broadcast %11 : vector<16x1xf32> to vector<16x32xf32>
    %13 = arith.subf %3, %12 : vector<16x32xf32>
    %14 = arith.mulf %13, %13 : vector<16x32xf32>
    %cst_9 = arith.constant dense<0.000000e+00> : vector<16xf32>
    %15 = vector.multi_reduction <add>, %14, %cst_9 [1] : vector<16x32xf32> to vector<16xf32>
    %16 = vector.shape_cast %15 : vector<16xf32> to vector<16x1xf32>
    %cst_10 = arith.constant 3.200000e+01 : f32
    %17 = vector.broadcast %cst_10 : f32 to vector<16x1xf32>
    %18 = arith.divf %16, %17 : vector<16x1xf32>
    %19 = vector.broadcast %11 : vector<16x1xf32> to vector<16x32xf32>
    %20 = arith.subf %3, %19 : vector<16x32xf32>
    %cst_11 = arith.constant 9.99999974E-6 : f32
    %21 = vector.broadcast %cst_11 : f32 to vector<16x1xf32>
    %22 = arith.addf %18, %21 : vector<16x1xf32>
    %23 = math.rsqrt %22 : vector<16x1xf32>
    %24 = vector.broadcast %23 : vector<16x1xf32> to vector<16x32xf32>
    %25 = arith.mulf %20, %24 : vector<16x32xf32>
    %26 = vector.broadcast %5 : vector<1x32xf32> to vector<16x32xf32>
    %27 = arith.mulf %25, %26 : vector<16x32xf32>
    %28 = vector.broadcast %7 : vector<1x32xf32> to vector<16x32xf32>
    %29 = arith.addf %27, %28 : vector<16x32xf32>
    %30 = vector.shape_cast %29 : vector<16x32xf32> to vector<1x16x32xf32>
    %31 = vector.shape_cast %30 : vector<1x16x32xf32> to vector<1x16x32xf32>
    %32 = vector.broadcast %31 : vector<1x16x32xf32> to vector<8x16x32xf32>
    %c0_12 = arith.constant 0 : index
    %c0_13 = arith.constant 0 : index
    %c0_14 = arith.constant 0 : index
    %c0_15 = arith.constant 0 : index
    %33 = vector.load %arg5[%c0_12, %c0_13, %c0_14, %c0_15] : memref<1x8x32x4xf32, #tpu.memory_space<vmem>>, vector<1x8x32x4xf32>
    %34 = vector.shape_cast %33 : vector<1x8x32x4xf32> to vector<8x32x4xf32>
    "tpu.trace_start"() <{level = 10 : i32, message = "htd,hdk->htk"}> : () -> ()
    %cst_16 = arith.constant dense<0.000000e+00> : vector<8x16x4xf32>
    %35 = tpu.matmul %32, %34, %cst_16 {dimension_numbers = #tpu.dot_dimension_numbers<[2], [1], [1], [2], [0, 0, 0, 1, 1, 2], [0], [0]>} : vector<8x16x32xf32>, vector<8x32x4xf32>, vector<8x16x4xf32> -> vector<8x16x4xf32>
    "tpu.trace_stop"() : () -> ()
    %c0_17 = arith.constant 0 : index
    %c0_18 = arith.constant 0 : index
    %c0_19 = arith.constant 0 : index
    %c0_20 = arith.constant 0 : index
    %36 = vector.load %arg6[%c0_17, %c0_18, %c0_19, %c0_20] : memref<1x8x32x4xf32, #tpu.memory_space<vmem>>, vector<1x8x32x4xf32>
    %37 = vector.shape_cast %36 : vector<1x8x32x4xf32> to vector<8x32x4xf32>
    "tpu.trace_start"() <{level = 10 : i32, message = "htd,hdk->htk"}> : () -> ()
    %cst_21 = arith.constant dense<0.000000e+00> : vector<8x16x4xf32>
    %38 = tpu.matmul %32, %37, %cst_21 {dimension_numbers = #tpu.dot_dimension_numbers<[2], [1], [1], [2], [0, 0, 0, 1, 1, 2], [0], [0]>} : vector<8x16x32xf32>, vector<8x32x4xf32>, vector<8x16x4xf32> -> vector<8x16x4xf32>
    "tpu.trace_stop"() : () -> ()
    %c0_22 = arith.constant 0 : index
    %c0_23 = arith.constant 0 : index
    %c0_24 = arith.constant 0 : index
    %c0_25 = arith.constant 0 : index
    %39 = vector.load %arg7[%c0_22, %c0_23, %c0_24, %c0_25] : memref<1x8x32x4xf32, #tpu.memory_space<vmem>>, vector<1x8x32x4xf32>
    %40 = vector.shape_cast %39 : vector<1x8x32x4xf32> to vector<8x32x4xf32>
    "tpu.trace_start"() <{level = 10 : i32, message = "htd,hdk->htk"}> : () -> ()
    %cst_26 = arith.constant dense<0.000000e+00> : vector<8x16x4xf32>
    %41 = tpu.matmul %32, %40, %cst_26 {dimension_numbers = #tpu.dot_dimension_numbers<[2], [1], [1], [2], [0, 0, 0, 1, 1, 2], [0], [0]>} : vector<8x16x32xf32>, vector<8x32x4xf32>, vector<8x16x4xf32> -> vector<8x16x4xf32>
    "tpu.trace_stop"() : () -> ()
    "tpu.trace_start"() <{level = 10 : i32, message = "htd,hud->htu"}> : () -> ()
    %cst_27 = arith.constant dense<0.000000e+00> : vector<8x16x16xf32>
    %42 = tpu.matmul %35, %38, %cst_27 {dimension_numbers = #tpu.dot_dimension_numbers<[2], [2], [1], [1], [0, 0, 0, 1, 1, 1], [0], [0]>} : vector<8x16x4xf32>, vector<8x16x4xf32>, vector<8x16x16xf32> -> vector<8x16x16xf32>
    "tpu.trace_stop"() : () -> ()
    %cst_28 = arith.constant 5.000000e-01 : f32
    %43 = vector.broadcast %cst_28 : f32 to vector<8x16x16xf32>
    %44 = arith.mulf %42, %43 : vector<8x16x16xf32>
    %c0_29 = arith.constant 0 : index
    %c0_30 = arith.constant 0 : index
    %45 = vector.load %arg2[%c0_29, %c0_30] : memref<16x16xf32, #tpu.memory_space<vmem>>, vector<16x16xf32>
    %46 = vector.shape_cast %45 : vector<16x16xf32> to vector<1x16x16xf32>
    %47 = vector.broadcast %46 : vector<1x16x16xf32> to vector<8x16x16xf32>
    %48 = arith.addf %44, %47 : vector<8x16x16xf32>
    %cst_31 = arith.constant dense<0xFF800000> : vector<8x16xf32>
    %49 = vector.multi_reduction <maximumf>, %48, %cst_31 [2] : vector<8x16x16xf32> to vector<8x16xf32>
    %50 = vector.shape_cast %49 : vector<8x16xf32> to vector<8x16x1xf32>
    %51 = vector.broadcast %50 : vector<8x16x1xf32> to vector<8x16x16xf32>
    %52 = arith.subf %48, %51 : vector<8x16x16xf32>
    %53 = math.exp %52 : vector<8x16x16xf32>
    %cst_32 = arith.constant dense<0.000000e+00> : vector<8x16xf32>
    %54 = vector.multi_reduction <add>, %53, %cst_32 [2] : vector<8x16x16xf32> to vector<8x16xf32>
    %55 = vector.shape_cast %54 : vector<8x16xf32> to vector<8x16x1xf32>
    %56 = vector.broadcast %55 : vector<8x16x1xf32> to vector<8x16x16xf32>
    %57 = arith.divf %53, %56 : vector<8x16x16xf32>
    "tpu.trace_start"() <{level = 10 : i32, message = "htu,hud->htd"}> : () -> ()
    %cst_33 = arith.constant dense<0.000000e+00> : vector<8x16x4xf32>
    %58 = tpu.matmul %57, %41, %cst_33 {dimension_numbers = #tpu.dot_dimension_numbers<[2], [1], [1], [2], [0, 0, 0, 1, 1, 2], [0], [0]>} : vector<8x16x16xf32>, vector<8x16x4xf32>, vector<8x16x4xf32> -> vector<8x16x4xf32>
    "tpu.trace_stop"() : () -> ()
    %c0_34 = arith.constant 0 : index
    %c0_35 = arith.constant 0 : index
    %c0_36 = arith.constant 0 : index
    %c0_37 = arith.constant 0 : index
    %59 = vector.load %arg8[%c0_34, %c0_35, %c0_36, %c0_37] : memref<1x8x4x32xf32, #tpu.memory_space<vmem>>, vector<1x8x4x32xf32>
    %60 = vector.shape_cast %59 : vector<1x8x4x32xf32> to vector<8x4x32xf32>
    "tpu.trace_start"() <{level = 10 : i32, message = "htd,hdk->htk"}> : () -> ()
    %cst_38 = arith.constant dense<0.000000e+00> : vector<8x16x32xf32>
    %61 = tpu.matmul %58, %60, %cst_38 {dimension_numbers = #tpu.dot_dimension_numbers<[2], [1], [1], [2], [0, 0, 0, 1, 1, 2], [0], [0]>} : vector<8x16x4xf32>, vector<8x4x32xf32>, vector<8x16x32xf32> -> vector<8x16x32xf32>
    "tpu.trace_stop"() : () -> ()
    %cst_39 = arith.constant dense<0.000000e+00> : vector<16x32xf32>
    %62 = vector.multi_reduction <add>, %61, %cst_39 [0] : vector<8x16x32xf32> to vector<16x32xf32>
    %63 = arith.addf %3, %62 : vector<16x32xf32>
    %c0_40 = arith.constant 0 : index
    %c0_41 = arith.constant 0 : index
    %c0_42 = arith.constant 0 : index
    %64 = vector.load %arg9[%c0_40, %c0_41, %c0_42] : memref<1x1x32xf32, #tpu.memory_space<vmem>>, vector<1x1x32xf32>
    %65 = vector.shape_cast %64 : vector<1x1x32xf32> to vector<1x32xf32>
    %66 = vector.broadcast %65 : vector<1x32xf32> to vector<16x32xf32>
    %67 = arith.addf %63, %66 : vector<16x32xf32>
    %c0_43 = arith.constant 0 : index
    %c0_44 = arith.constant 0 : index
    %c0_45 = arith.constant 0 : index
    %68 = vector.load %arg10[%c0_43, %c0_44, %c0_45] : memref<1x1x32xf32, #tpu.memory_space<vmem>>, vector<1x1x32xf32>
    %69 = vector.shape_cast %68 : vector<1x1x32xf32> to vector<1x32xf32>
    %c0_46 = arith.constant 0 : index
    %c0_47 = arith.constant 0 : index
    %c0_48 = arith.constant 0 : index
    %70 = vector.load %arg11[%c0_46, %c0_47, %c0_48] : memref<1x1x32xf32, #tpu.memory_space<vmem>>, vector<1x1x32xf32>
    %71 = vector.shape_cast %70 : vector<1x1x32xf32> to vector<1x32xf32>
    %cst_49 = arith.constant dense<0.000000e+00> : vector<16xf32>
    %72 = vector.multi_reduction <add>, %67, %cst_49 [1] : vector<16x32xf32> to vector<16xf32>
    %73 = vector.shape_cast %72 : vector<16xf32> to vector<16x1xf32>
    %cst_50 = arith.constant 3.200000e+01 : f32
    %74 = vector.broadcast %cst_50 : f32 to vector<16x1xf32>
    %75 = arith.divf %73, %74 : vector<16x1xf32>
    %76 = vector.broadcast %75 : vector<16x1xf32> to vector<16x32xf32>
    %77 = arith.subf %67, %76 : vector<16x32xf32>
    %78 = arith.mulf %77, %77 : vector<16x32xf32>
    %cst_51 = arith.constant dense<0.000000e+00> : vector<16xf32>
    %79 = vector.multi_reduction <add>, %78, %cst_51 [1] : vector<16x32xf32> to vector<16xf32>
    %80 = vector.shape_cast %79 : vector<16xf32> to vector<16x1xf32>
    %cst_52 = arith.constant 3.200000e+01 : f32
    %81 = vector.broadcast %cst_52 : f32 to vector<16x1xf32>
    %82 = arith.divf %80, %81 : vector<16x1xf32>
    %83 = vector.broadcast %75 : vector<16x1xf32> to vector<16x32xf32>
    %84 = arith.subf %67, %83 : vector<16x32xf32>
    %cst_53 = arith.constant 9.99999974E-6 : f32
    %85 = vector.broadcast %cst_53 : f32 to vector<16x1xf32>
    %86 = arith.addf %82, %85 : vector<16x1xf32>
    %87 = math.rsqrt %86 : vector<16x1xf32>
    %88 = vector.broadcast %87 : vector<16x1xf32> to vector<16x32xf32>
    %89 = arith.mulf %84, %88 : vector<16x32xf32>
    %90 = vector.broadcast %69 : vector<1x32xf32> to vector<16x32xf32>
    %91 = arith.mulf %89, %90 : vector<16x32xf32>
    %92 = vector.broadcast %71 : vector<1x32xf32> to vector<16x32xf32>
    %93 = arith.addf %91, %92 : vector<16x32xf32>
    %c0_54 = arith.constant 0 : index
    %c0_55 = arith.constant 0 : index
    %c0_56 = arith.constant 0 : index
    %94 = vector.load %arg12[%c0_54, %c0_55, %c0_56] : memref<1x32x64xf32, #tpu.memory_space<vmem>>, vector<1x32x64xf32>
    %95 = vector.shape_cast %94 : vector<1x32x64xf32> to vector<32x64xf32>
    %cst_57 = arith.constant dense<0.000000e+00> : vector<16x64xf32>
    %96 = tpu.matmul %93, %95, %cst_57 {dimension_numbers = #tpu.dot_dimension_numbers<[1], [0], [0], [1], [0, 0, 1, 1], [], []>} : vector<16x32xf32>, vector<32x64xf32>, vector<16x64xf32> -> vector<16x64xf32>
    %c0_58 = arith.constant 0 : index
    %c0_59 = arith.constant 0 : index
    %c0_60 = arith.constant 0 : index
    %97 = vector.load %arg13[%c0_58, %c0_59, %c0_60] : memref<1x1x64xf32, #tpu.memory_space<vmem>>, vector<1x1x64xf32>
    %98 = vector.shape_cast %97 : vector<1x1x64xf32> to vector<1x64xf32>
    %99 = vector.broadcast %98 : vector<1x64xf32> to vector<16x64xf32>
    %100 = arith.addf %96, %99 : vector<16x64xf32>
    %cst_61 = arith.constant 0.000000e+00 : f32
    %101 = vector.broadcast %cst_61 : f32 to vector<16x64xf32>
    %102 = arith.maximumf %100, %101 : vector<16x64xf32>
    %c0_62 = arith.constant 0 : index
    %c0_63 = arith.constant 0 : index
    %c0_64 = arith.constant 0 : index
    %103 = vector.load %arg14[%c0_62, %c0_63, %c0_64] : memref<1x64x32xf32, #tpu.memory_space<vmem>>, vector<1x64x32xf32>
    %104 = vector.shape_cast %103 : vector<1x64x32xf32> to vector<64x32xf32>
    %cst_65 = arith.constant dense<0.000000e+00> : vector<16x32xf32>
    %105 = tpu.matmul %102, %104, %cst_65 {dimension_numbers = #tpu.dot_dimension_numbers<[1], [0], [0], [1], [0, 0, 1, 1], [], []>} : vector<16x64xf32>, vector<64x32xf32>, vector<16x32xf32> -> vector<16x32xf32>
    %c0_66 = arith.constant 0 : index
    %c0_67 = arith.constant 0 : index
    %c0_68 = arith.constant 0 : index
    %106 = vector.load %arg15[%c0_66, %c0_67, %c0_68] : memref<1x1x32xf32, #tpu.memory_space<vmem>>, vector<1x1x32xf32>
    %107 = vector.shape_cast %106 : vector<1x1x32xf32> to vector<1x32xf32>
    %108 = vector.broadcast %107 : vector<1x32xf32> to vector<16x32xf32>
    %109 = arith.addf %105, %108 : vector<16x32xf32>
    %110 = arith.addf %67, %109 : vector<16x32xf32>
    %c0_69 = arith.constant 0 : index
    %c0_70 = arith.constant 0 : index
    %111 = vector.load %arg17[%c0_69, %c0_70] : memref<16x32xf32, #tpu.memory_space<vmem>>, vector<16x32xf32>
    tpu.vector_store %arg17[%c0_69, %c0_70], %110 {strides = array<i32>} : memref<16x32xf32, #tpu.memory_space<vmem>>, vector<16x32xf32>,
    %c0_71 = arith.constant 0 : index
    %c0_72 = arith.constant 0 : index
    %112 = vector.load %arg16[%c0_71, %c0_72] : memref<16x32xf32, #tpu.memory_space<vmem>>, vector<16x32xf32>
    tpu.vector_store %arg16[%c0_71, %c0_72], %110 {strides = array<i32>} : memref<16x32xf32, #tpu.memory_space<vmem>>, vector<16x32xf32>,
    return
  }
  func.func @transform_0(%arg0: i32) -> (i32, i32) {
    %c0_i32 = arith.constant 0 : i32
    %c0_i32_0 = arith.constant 0 : i32
    %c0_i32_1 = arith.constant 0 : i32
    return %c0_i32, %c0_i32_0 : i32, i32
  }
  func.func @transform_1(%arg0: i32) -> (i32, i32) {
    %c0_i32 = arith.constant 0 : i32
    %c0_i32_0 = arith.constant 0 : i32
    %c0_i32_1 = arith.constant 0 : i32
    return %c0_i32, %c0_i32_0 : i32, i32
  }
  func.func @transform_2(%arg0: i32) -> (i32, i32, i32) {
    %c0_i32 = arith.constant 0 : i32
    %c0_i32_0 = arith.constant 0 : i32
    %c0_i32_1 = arith.constant 0 : i32
    return %arg0, %c0_i32, %c0_i32_0 : i32, i32, i32
  }
  func.func @transform_3(%arg0: i32) -> (i32, i32, i32) {
    %c0_i32 = arith.constant 0 : i32
    %c0_i32_0 = arith.constant 0 : i32
    %c0_i32_1 = arith.constant 0 : i32
    return %arg0, %c0_i32, %c0_i32_0 : i32, i32, i32
  }
  func.func @transform_4(%arg0: i32) -> (i32, i32, i32, i32) {
    %c0_i32 = arith.constant 0 : i32
    %c0_i32_0 = arith.constant 0 : i32
    %c0_i32_1 = arith.constant 0 : i32
    %c0_i32_2 = arith.constant 0 : i32
    return %arg0, %c0_i32, %c0_i32_0, %c0_i32_1 : i32, i32, i32, i32
  }
  func.func @transform_5(%arg0: i32) -> (i32, i32, i32, i32) {
    %c0_i32 = arith.constant 0 : i32
    %c0_i32_0 = arith.constant 0 : i32
    %c0_i32_1 = arith.constant 0 : i32
    %c0_i32_2 = arith.constant 0 : i32
    return %arg0, %c0_i32, %c0_i32_0, %c0_i32_1 : i32, i32, i32, i32
  }
  func.func @transform_6(%arg0: i32) -> (i32, i32, i32, i32) {
    %c0_i32 = arith.constant 0 : i32
    %c0_i32_0 = arith.constant 0 : i32
    %c0_i32_1 = arith.constant 0 : i32
    %c0_i32_2 = arith.constant 0 : i32
    return %arg0, %c0_i32, %c0_i32_0, %c0_i32_1 : i32, i32, i32, i32
  }
  func.func @transform_7(%arg0: i32) -> (i32, i32, i32, i32) {
    %c0_i32 = arith.constant 0 : i32
    %c0_i32_0 = arith.constant 0 : i32
    %c0_i32_1 = arith.constant 0 : i32
    %c0_i32_2 = arith.constant 0 : i32
    return %arg0, %c0_i32, %c0_i32_0, %c0_i32_1 : i32, i32, i32, i32
  }
  func.func @transform_8(%arg0: i32) -> (i32, i32, i32) {
    %c0_i32 = arith.constant 0 : i32
    %c0_i32_0 = arith.constant 0 : i32
    %c0_i32_1 = arith.constant 0 : i32
    return %arg0, %c0_i32, %c0_i32_0 : i32, i32, i32
  }
  func.func @transform_9(%arg0: i32) -> (i32, i32, i32) {
    %c0_i32 = arith.constant 0 : i32
    %c0_i32_0 = arith.constant 0 : i32
    %c0_i32_1 = arith.constant 0 : i32
    return %arg0, %c0_i32, %c0_i32_0 : i32, i32, i32
  }
  func.func @transform_10(%arg0: i32) -> (i32, i32, i32) {
    %c0_i32 = arith.constant 0 : i32
    %c0_i32_0 = arith.constant 0 : i32
    %c0_i32_1 = arith.constant 0 : i32
    return %arg0, %c0_i32, %c0_i32_0 : i32, i32, i32
  }
  func.func @transform_11(%arg0: i32) -> (i32, i32, i32) {
    %c0_i32 = arith.constant 0 : i32
    %c0_i32_0 = arith.constant 0 : i32
    %c0_i32_1 = arith.constant 0 : i32
    return %arg0, %c0_i32, %c0_i32_0 : i32, i32, i32
  }
  func.func @transform_12(%arg0: i32) -> (i32, i32, i32) {
    %c0_i32 = arith.constant 0 : i32
    %c0_i32_0 = arith.constant 0 : i32
    %c0_i32_1 = arith.constant 0 : i32
    return %arg0, %c0_i32, %c0_i32_0 : i32, i32, i32
  }
  func.func @transform_13(%arg0: i32) -> (i32, i32, i32) {
    %c0_i32 = arith.constant 0 : i32
    %c0_i32_0 = arith.constant 0 : i32
    %c0_i32_1 = arith.constant 0 : i32
    return %arg0, %c0_i32, %c0_i32_0 : i32, i32, i32
  }
  func.func @transform_14(%arg0: i32) -> (i32, i32, i32) {
    %c0_i32 = arith.constant 0 : i32
    %c0_i32_0 = arith.constant 0 : i32
    %c0_i32_1 = arith.constant 0 : i32
    return %arg0, %c0_i32, %c0_i32_0 : i32, i32, i32
  }
  func.func @transform_15(%arg0: i32) -> (i32, i32) {
    %c0_i32 = arith.constant 0 : i32
    %c0_i32_0 = arith.constant 0 : i32
    %c0_i32_1 = arith.constant 0 : i32
    return %c0_i32, %c0_i32_0 : i32, i32
  }
}

</mosaic_0001>

<bundles_post_ra>
// kernel: transformer_mapper_forward.2
= control target key start
LH: loop header
LB: loop body
LE: loop exit
PB: predicated region body
PF: predicated region fallthrough
CT: control target
= control target key end

     0   :  { %v141_v0 = vmov 0.0   ;;  %vm142_vm0 = vmmov 0   ;;  %vm30_vm1 = vcmask 523264   ;;  %s196_s1 = inlined_call_operand.vmem [shape: f32[64,128], index: 1, kind: input, shape index: {}]   ;;  %s197_s0 = inlined_call_operand.vmem [shape: f32[2,64], index: 0, kind: input, shape index: {}]   ;;  %s198_s2 = inlined_call_operand.vmem [shape: f32[1,128], index: 2, kind: input, shape index: {}]   ;;  %s199_s3 = inlined_call_operand.vmem [shape: f32[2,128], index: 3, kind: output, shape index: {}]  }
   0x1   :  { %120 = vmatprep.subr.mxu0 %v141_v0  ;;  %v22_v1 = vld [vmem:[%s196_s1 + $0x38] sm:$0xff]  ;;  %v21_v2 = vld [vmem:[%s196_s1 + $0x30] sm:$0xff]  ;;  %136 = vmatprep.mubr.msk.f32.mxu0 %vm142_vm0, %v141_v0  ;;  %v20_v3 = vld [vmem:[%s196_s1 + $0x28] sm:$0xff] }
   0x2   :  { %121 = vmatpush3.msra.mxu0 %v22_v1  ;;  %v19_v4 = vld [vmem:[%s196_s1 + $0x20] sm:$0xff]  ;;  %v18_v5 = vld [vmem:[%s196_s1 + $0x18] sm:$0xff]  ;;  %v17_v6 = vld [vmem:[%s196_s1 + $0x10] sm:$0xff] }
   0x3   :  { %122 = vmatprep.subr.mxu0 %v141_v0  ;;  %v16_v7 = vld [vmem:[%s196_s1 + $0x8] sm:$0xff]  ;;  %v15_v8 = vld [vmem:[%s196_s1] sm:$0xff] }
   0x4   :  { %123 = vmatpush3.msra.mxu0 %v21_v2  ;;  %v14_v9 = vld [vmem:[%s197_s0] sm:$0x3] }
   0x5   :  { %124 = vmatprep.subr.mxu0 %v141_v0  ;;  %v109_v10 = vld [vmem:[%s198_s2] ss:$0 sm:$0xff] }
   0x6   :  { %125 = vmatpush3.msra.mxu0 %v20_v3 }
   0x7   :  { %126 = vmatprep.subr.mxu0 %v141_v0 }
   0x8   :  { %127 = vmatpush3.msra.mxu0 %v19_v4 }
   0x9   :  { %128 = vmatprep.subr.mxu0 %v141_v0 }
   0xa   :  { %129 = vmatpush3.msra.mxu0 %v18_v5 }
   0xb   :  { %130 = vmatprep.subr.mxu0 %v141_v0 }
   0xc   :  { %131 = vmatpush3.msra.mxu0 %v17_v6 }
   0xd   :  { %132 = vmatprep.subr.mxu0 %v141_v0 }
   0xe   :  { %133 = vmatpush3.msra.mxu0 %v16_v7 }
   0xf   :  { %134 = vmatprep.subr.mxu0 %v141_v0 }
  0x10   :  { %135 = vmatpush3.msra.mxu0 %v15_v8 }
  0x11   :  { %137 = vmatmul.mubr.msk.f32.vlgmr.msra.gmra.mxu0 %vm30_vm1, %v14_v9 }
  0xd1   :  { %v100_v11 = vpop.f32.mrf.mxu0 }
  0xd2   :  { %v101_v12 = vadd.f32 %v109_v10, %v100_v11 }
  0xd3   :  { %v138_v13 = vpop.f32.mrf.mxu0 }
  0xd4   :  { %104 = vst [vmem:[%s199_s3] sm:$0x3] %v101_v12 }

// kernel: transformer_mapper_forward.3
= control target key start
LH: loop header
LB: loop body
LE: loop exit
PB: predicated region body
PF: predicated region fallthrough
CT: control target
= control target key end

     0   :  { %s6327_s18 = smov 0   ;;  %s7040_s0 = inlined_call_operand.vmem [shape: f32[16,32], index: 0, kind: input, shape index: {}]   ;;  %s7041_s1 = inlined_call_operand.vmem [shape: f32[16,16], index: 1, kind: input, shape index: {}]   ;;  %s7042_s2 = inlined_call_operand.vmem [shape: f32[2,1,32], index: 2, kind: input, shape index: {}]   ;;  %s7043_s3 = inlined_call_operand.vmem [shape: f32[2,1,32], index: 3, kind: input, shape index: {}]   ;;  %s7044_s4 = inlined_call_operand.vmem [shape: f32[2,8,32,4], index: 4, kind: input, shape index: {}]   ;;  %s7045_s5 = inlined_call_operand.vmem [shape: f32[2,8,32,4], index: 5, kind: input, shape index: {}]   ;;  %s7046_s6 = inlined_call_operand.vmem [shape: f32[2,8,32,4], index: 6, kind: input, shape index: {}]   ;;  %s7047_s7 = inlined_call_operand.vmem [shape: f32[2,8,4,32], index: 7, kind: input, shape index: {}]   ;;  %s7048_s8 = inlined_call_operand.vmem [shape: f32[2,1,32], index: 8, kind: input, shape index: {}]   ;;  %s7049_s9 = inlined_call_operand.vmem [shape: f32[2,1,32], index: 9, kind: input, shape index: {}]   ;;  %s7050_s10 = inlined_call_operand.vmem [shape: f32[2,1,32], index: 10, kind: input, shape index: {}]   ;;  %s7051_s11 = inlined_call_operand.vmem [shape: f32[2,32,64], index: 11, kind: input, shape index: {}]   ;;  %s7052_s12 = inlined_call_operand.vmem [shape: f32[2,1,64], index: 12, kind: input, shape index: {}]   ;;  %s7053_s13 = inlined_call_operand.vmem [shape: f32[2,64,32], index: 13, kind: input, shape index: {}]   ;;  %s7054_s14 = inlined_call_operand.vmem [shape: f32[2,1,32], index: 14, kind: input, shape index: {}]   ;;  %s7055_s15 = inlined_call_operand.vmem [shape: f32[16,32], index: 15, kind: output, shape index: {}]  }
   0x1   :  { %7060 = sst [smem:[#allocation5_spill]] %s7041_s1 }
   0x2   :  { %7061 = sst [smem:[#allocation6_spill]] %s7043_s3 }
   0x3   :  { %7062 = sst [smem:[#allocation7_spill]] %s7044_s4 }
   0x4   :  { %7063 = sst [smem:[#allocation8_spill]] %s7045_s5 }
   0x5   :  { %7064 = sst [smem:[#allocation9_spill]] %s7046_s6 }
   0x6   :  { %7065 = sst [smem:[#allocation10_spill]] %s7047_s7 }
   0x7   :  { %7066 = sst [smem:[#allocation11_spill]] %s7055_s15 }
   0x8 LB: > { %7067 = sst [smem:[#allocation3_spill]] %s6245_s18  ;;  %s5307_s19 = sadd.s32 4294967295, %s6245_s18   ;;  %s6245_s18 = sphi %s6327_s18, %s25_s18  }
   0x9   : > { %p5310_p0 = scmp.ge.s32.totalorder %s6245_s18, 1  ;;  %p538_p1 = scmp.lt.s32.totalorder %s6245_s18, 3 }
   0xb   : > { %p539_p2 = pnand %p5310_p0, %p538_p1 }
   0xd   : > { %542 = sbr.rel (%p539_p2) target bundleno = 2247 (0x8c7), region = 80 }
  0x12   : > { %p627_p3 = scmp.lt.s32.totalorder %s5307_s19, 1  ;;  %s7069_s4 = sld [smem:[#allocation7_spill]] }
  0x13   : > { %s7070_s5 = sld [smem:[#allocation8_spill]]  ;;  %p5323_p4 = scmp.ne.s32.totalorder %s5307_s19, 0 }
  0x14   : > { %s6335_s20 = scalar_select %p627_p3, %s5307_s19, 1 }
  0x15   : > { %s7072_s6 = sld [smem:[#allocation9_spill]] }
  0x16   : > { %s5457_s27 = sshll.u32 %s6335_s20, 8  ;;  %s5460_s28 = sshll.u32 %s6335_s20, 5 }
  0x17   : > { %s7073_s7 = sld [smem:[#allocation10_spill]]  ;;  %s658_s17 = scalar_lea.vmem %s7049_s9, %s6335_s20 }
  0x18   : > { %s6350_s16 = scalar_lea.vmem %s7069_s4, %s5457_s27 }
  0x19   : > { %s6355_s22 = scalar_lea.vmem %s7070_s5, %s5457_s27  ;;  %s677_s5 = scalar_lea.vmem %s7054_s14, %s6335_s20 }
  0x1a   : > { %7071 = sst [smem:[#allocation4_spill]] %s6355_s22  ;;  %s661_s22 = scalar_lea.vmem %s7050_s10, %s6335_s20 }
  0x1b   : > { %s6360_s23 = scalar_lea.vmem %s7072_s6, %s5457_s27  ;;  %s6382_s27 = scalar_lea.vmem %s7051_s11, %s5460_s28 }
  0x1c   : > { %s669_s6 = scalar_lea.vmem %s7052_s12, %s6335_s20  ;;  %681 = sbr.rel (%p5323_p4) target bundleno = 35 (0x23), region = 84 }
  0x1d   : > { %s6365_s25 = scalar_lea.vmem %s7073_s7, %s5460_s28  ;;  %s5462_s7 = sshll.u32 %s6335_s20, 6 }
  0x1e   : > { %s6392_s29 = scalar_lea.vmem %s7053_s13, %s5462_s7 }
  0x21   : > { %v682_v0 = vld [vmem:[%s7040_s0] sm:$0xff]  ;;  %vm684_vm0 = vcmask 261120   ;;  %v683_v1 = vld [vmem:[%s7040_s0 + $0x8] sm:$0xff] }
  0x22   : > { %685 = vst.msk [vmem:[#allocation2] sm:$0xff] %vm684_vm0, %v682_v0  ;;  %686 = vst.msk [vmem:[#allocation2 + $0x8] sm:$0xff] %vm684_vm0, %v683_v1 }
  0x23 PF: > { %vm691_vm1 = vcmask 261120   ;;  %v738_v16 = vld [vmem:[%s6350_s16 + $0x18] sm:$0xff]  ;;  %v737_v18 = vld [vmem:[%s6350_s16 + $0x10] sm:$0xff]  ;;  %v736_v20 = vld [vmem:[%s6350_s16 + $0x8] sm:$0xff]  ;;  %s7074_s1 = scalar_lea.vmem %s7042_s2, %s6335_s20  ;;  %s7075_s26 = sld [smem:[#allocation6_spill]]  ;;  %vm2637_vm2 = vcmask 31744  }
  0x24   : > { %v742_v17 = vld [vmem:[%s6350_s16 + $0x38] sm:$0xff]  ;;  %5711 = vmatprep.subr.mxu0 %v738_v16  ;;  %v741_v19 = vld [vmem:[%s6350_s16 + $0x30] sm:$0xff]  ;;  %v740_v21 = vld [vmem:[%s6350_s16 + $0x28] sm:$0xff]  ;;  %s7077_s30 = sld [smem:[#allocation4_spill]]  ;;  %vm3368_vm3 = vcmask 130048   ;;  %vm4207_vm4 = vcmask 1043456   ;;  %s7079_s7 = scalar_lea.vmem %s7048_s8, %s6335_s20 }
  0x25   : > { %5722 = vmatprep.subr.mxu1 %v742_v17  ;;  %5712 = vmatpush3.msra.mxu0 %v738_v16  ;;  %v735_v22 = vld [vmem:[%s6350_s16] sm:$0xff]  ;;  %v746_v24 = vld [vmem:[%s6350_s16 + $0x58] sm:$0xff]  ;;  %v745_v42 = vld [vmem:[%s6350_s16 + $0x50] sm:$0xff]  ;;  %s7078_s21 = sld [smem:[#allocation5_spill]]  ;;  %vm5068_vm5 = vcmask 523264  }
  0x26   : > { %5723 = vmatpush3.msra.mxu1 %v742_v17  ;;  %5713 = vmatprep.subr.mxu0 %v737_v18  ;;  %v739_v23 = vld [vmem:[%s6350_s16 + $0x20] sm:$0xff]  ;;  %v750_v25 = vld [vmem:[%s6350_s16 + $0x78] sm:$0xff]  ;;  %v749_v43 = vld [vmem:[%s6350_s16 + $0x70] sm:$0xff] }
  0x27   : > { %5724 = vmatprep.subr.mxu1 %v741_v19  ;;  %5714 = vmatpush3.msra.mxu0 %v737_v18  ;;  %v5324_v33 = vld [vmem:[%s7074_s1] ss:$0 sm:$0xff]  ;;  %v744_v44 = vld [vmem:[%s6350_s16 + $0x48] sm:$0xff]  ;;  %v754_v48 = vld [vmem:[%s6350_s16 + $0x98] sm:$0xff] }
  0x28   : > { %5725 = vmatpush3.msra.mxu1 %v741_v19  ;;  %5715 = vmatprep.subr.mxu0 %v736_v20  ;;  %v748_v45 = vld [vmem:[%s6350_s16 + $0x68] sm:$0xff]  ;;  %v743_v46 = vld [vmem:[%s6350_s16 + $0x40] sm:$0xff]  ;;  %v758_v49 = vld [vmem:[%s6350_s16 + $0xb8] sm:$0xff] }
  0x29   : > { %v687_v2 = vld [vmem:[#allocation2] sm:$0xff]  ;;  %v688_v3 = vld [vmem:[#allocation2 + $0x8] sm:$0xff]  ;;  %5726 = vmatprep.subr.mxu1 %v740_v21  ;;  %5716 = vmatpush3.msra.mxu0 %v736_v20  ;;  %s7076_s4 = scalar_lea.vmem %s7075_s26, %s6335_s20  ;;  %v753_v50 = vld [vmem:[%s6350_s16 + $0x90] sm:$0xff] }
  0x2a   : > { %v692_v4 = vsel %vm691_vm1, %v687_v2, 0.0  ;;  %v695_v5 = vsel %vm691_vm1, %v688_v3, 0.0  ;;  %5727 = vmatpush3.msra.mxu1 %v740_v21  ;;  %5717 = vmatprep.subr.mxu0 %v735_v22  ;;  %v5325_v35 = vld [vmem:[%s7076_s4] ss:$0 sm:$0xff]  ;;  %v757_v51 = vld [vmem:[%s6350_s16 + $0xb0] sm:$0xff]  ;;  %v752_v52 = vld [vmem:[%s6350_s16 + $0x88] sm:$0xff] }
  0x2b   : > { %693 = vadd.xlane.f32.xlu0 %v692_v4  ;;  %5728 = vmatprep.subr.mxu1 %v739_v23  ;;  %v747_v47 = vld [vmem:[%s6350_s16 + $0x60] sm:$0xff]  ;;  %v756_v53 = vld [vmem:[%s6350_s16 + $0xa8] sm:$0xff]  ;;  %v762_v56 = vld [vmem:[%s6350_s16 + $0xd8] sm:$0xff]  ;;  %s7080_s4 = sld [smem:[#allocation11_spill]] }
  0x2c   : > { %5718 = vmatpush3.msra.mxu0 %v735_v22  ;;  %5729 = vmatpush3.msra.mxu1 %v739_v23  ;;  %v751_v54 = vld [vmem:[%s6350_s16 + $0x80] sm:$0xff]  ;;  %v766_v57 = vld [vmem:[%s6350_s16 + $0xf8] sm:$0xff]  ;;  %v761_v58 = vld [vmem:[%s6350_s16 + $0xd0] sm:$0xff] }
  0x2d   : > { %5733 = vmatprep.subr.mxu0 %v746_v24  ;;  %5744 = vmatprep.subr.mxu1 %v750_v25  ;;  %v755_v55 = vld [vmem:[%s6350_s16 + $0xa0] sm:$0xff]  ;;  %v765_v59 = vld [vmem:[%s6350_s16 + $0xf0] sm:$0xff]  ;;  %v760_v60 = vld [vmem:[%s6350_s16 + $0xc8] sm:$0xff] }
  0x2e   : > { %v764_v61 = vld [vmem:[%s6350_s16 + $0xe8] sm:$0xff]  ;;  %v759_v62 = vld [vmem:[%s6350_s16 + $0xc0] sm:$0xff]  ;;  %v1376_v0 = vld [vmem:[%s7077_s30 + $0x18] sm:$0xff] }
  0x2f   : > { %696 = vadd.xlane.f32.xlu0 %v695_v5  ;;  %v763_v63 = vld [vmem:[%s6350_s16 + $0xe0] sm:$0xff]  ;;  %v1380_v1 = vld [vmem:[%s7077_s30 + $0x38] sm:$0xff]  ;;  %v1374_v4 = vld [vmem:[%s7077_s30 + $0x8] sm:$0xff] }
  0x30   : > { %v1378_v5 = vld [vmem:[%s7077_s30 + $0x28] sm:$0xff]  ;;  %v1392_v16 = vld [vmem:[%s7077_s30 + $0x98] sm:$0xff]  ;;  %v1391_v18 = vld [vmem:[%s7077_s30 + $0x90] sm:$0xff] }
  0x31   : > { %v1396_v17 = vld [vmem:[%s7077_s30 + $0xb8] sm:$0xff]  ;;  %v1395_v19 = vld [vmem:[%s7077_s30 + $0xb0] sm:$0xff]  ;;  %v1390_v20 = vld [vmem:[%s7077_s30 + $0x88] sm:$0xff] }
  0x32   : > { %v1394_v21 = vld [vmem:[%s7077_s30 + $0xa8] sm:$0xff]  ;;  %v1389_v22 = vld [vmem:[%s7077_s30 + $0x80] sm:$0xff] }
  0x33   : > { %v1393_v23 = vld [vmem:[%s7077_s30 + $0xa0] sm:$0xff] }
  0xb4   : > { %v694_v6 = vpop.xlane.xlu0 %693 }
  0xb5   : > { %v699_v7 = vmul.f32 0.03125, %v694_v6  ;;  %v1373_v6 = vld [vmem:[%s7077_s30] sm:$0xff] }
  0xb7   : > { %v701_v8 = vsub.f32 %v687_v2, %v699_v7  ;;  %v1375_v2 = vld [vmem:[%s7077_s30 + $0x10] sm:$0xff]  ;;  %v1377_v7 = vld [vmem:[%s7077_s30 + $0x20] sm:$0xff] }
  0xb8   : > { %v697_v9 = vpop.xlane.xlu0 %696 }
  0xb9   : > { %v700_v10 = vmul.f32 0.03125, %v697_v9  ;;  %v703_v11 = vmul.f32 %v701_v8, %v701_v8  ;;  %v1388_v9 = vld [vmem:[%s7077_s30 + $0x78] sm:$0xff] }
  0xbb   : > { %v702_v12 = vsub.f32 %v688_v3, %v700_v10  ;;  %v705_v13 = vsel %vm691_vm1, %v703_v11, 0.0  ;;  %v1379_v3 = vld [vmem:[%s7077_s30 + $0x30] sm:$0xff] }
  0xbc   : > { %706 = vadd.xlane.f32.xlu1 %v705_v13  ;;  %v1383_v10 = vld [vmem:[%s7077_s30 + $0x50] sm:$0xff]  ;;  %v1386_v13 = vld [vmem:[%s7077_s30 + $0x68] sm:$0xff] }
  0xbd   : > { %v704_v14 = vmul.f32 %v702_v12, %v702_v12  ;;  %v1387_v11 = vld [vmem:[%s7077_s30 + $0x70] sm:$0xff] }
  0xbf   : > { %v708_v15 = vsel %vm691_vm1, %v704_v14, 0.0  ;;  %v1381_v14 = vld [vmem:[%s7077_s30 + $0x40] sm:$0xff] }
  0xc0   : > { %709 = vadd.xlane.f32.xlu1 %v708_v15  ;;  %v1385_v15 = vld [vmem:[%s7077_s30 + $0x60] sm:$0xff] }
 0x145   : > { %v707_v26 = vpop.xlane.xlu1 %706 }
 0x146   : > { %v711_v27 = vmul.f32 0.03125, %v707_v26  ;;  %v1399_v26 = vld [vmem:[%s7077_s30 + $0xd0] sm:$0xff] }
 0x148   : > { %v713_v28 = vadd.f32 1e-05, %v711_v27  ;;  %v1403_v27 = vld [vmem:[%s7077_s30 + $0xf0] sm:$0xff] }
 0x149   : > { %v710_v29 = vpop.xlane.xlu1 %709 }
 0x14a   : > { %6165 = vrsqrt.f32 %v713_v28  ;;  %v712_v30 = vmul.f32 0.03125, %v710_v29  ;;  %v1398_v28 = vld [vmem:[%s7077_s30 + $0xc8] sm:$0xff] }
 0x14b   : > { %v1402_v29 = vld [vmem:[%s7077_s30 + $0xe8] sm:$0xff] }
 0x14c   : > { %v714_v31 = vadd.f32 1e-05, %v712_v30  ;;  %v1397_v30 = vld [vmem:[%s7077_s30 + $0xc0] sm:$0xff] }
 0x14e   : > { %6167 = vrsqrt.f32 %v714_v31  ;;  %v1401_v31 = vld [vmem:[%s7077_s30 + $0xe0] sm:$0xff] }
 0x157   : > { %v6166_v32 = vpop.eup %6165 }
 0x158   : > { %v717_v34 = vmul.f32 %v6166_v32, %v701_v8  ;;  %v1384_v8 = vld [vmem:[%s7077_s30 + $0x58] sm:$0xff] }
 0x159   : > { %v2008_v32 = vld [vmem:[%s6360_s23 + $0x18] sm:$0xff] }
 0x15a   : > { %v725_v36 = vmul.f32 %v5324_v33, %v717_v34  ;;  %v2007_v34 = vld [vmem:[%s6360_s23 + $0x10] sm:$0xff] }
 0x15b   : > { %v6168_v37 = vpop.eup %6167 }
 0x15c   : > { %v6428_v38 = vadd.f32 %v5325_v35, %v725_v36  ;;  %v718_v39 = vmul.f32 %v6168_v37, %v702_v12  ;;  %v1382_v12 = vld [vmem:[%s7077_s30 + $0x48] sm:$0xff] }
 0x15d   : > { %v2006_v36 = vld [vmem:[%s6360_s23 + $0x8] sm:$0xff] }
 0x15e   : > { %v726_v40 = vmul.f32 %v5324_v33, %v718_v39  ;;  %5719 = vmatprep.mubr.msk.f32.mxu0 %vm691_vm1, %v6428_v38  ;;  %5730 = vmatprep.mubr.msk.f32.mxu1 %vm691_vm1, %v6428_v38  ;;  %v2012_v33 = vld [vmem:[%s6360_s23 + $0x38] sm:$0xff]  ;;  %v2010_v37 = vld [vmem:[%s6360_s23 + $0x28] sm:$0xff]  ;;  %v2005_v39 = vld [vmem:[%s6360_s23] sm:$0xff] }
 0x160   : > { %v6434_v41 = vadd.f32 %v5325_v35, %v726_v40  ;;  %v2011_v35 = vld [vmem:[%s6360_s23 + $0x30] sm:$0xff]  ;;  %v2009_v40 = vld [vmem:[%s6360_s23 + $0x20] sm:$0xff] }
 0x162   : > { %5720 = vmatmul.mubr.msk.f32.vlgmr.msra.gmra.mxu0 %vm691_vm1, %v6434_v41  ;;  %5731 = vmatmul.mubr.msk.f32.vlgmr.msra.gmra.mxu1 %vm691_vm1, %v6434_v41 }
 0x163   : > { %5734 = vmatpush3.msra.mxu0 %v746_v24  ;;  %5745 = vmatpush3.msra.mxu1 %v750_v25  ;;  %v1400_v24 = vld [vmem:[%s7077_s30 + $0xd8] sm:$0xff] }
 0x164   : > { %5735 = vmatprep.subr.mxu0 %v745_v42  ;;  %5741 = vmatprep.mubr.msk.f32.mxu0 %vm691_vm1, %v6428_v38  ;;  %v1404_v25 = vld [vmem:[%s7077_s30 + $0xf8] sm:$0xff] }
 0x165   : > { %5746 = vmatprep.subr.mxu1 %v749_v43  ;;  %5752 = vmatprep.mubr.msk.f32.mxu1 %vm691_vm1, %v6428_v38 }
 0x166   : > { %5736 = vmatpush3.msra.mxu0 %v745_v42  ;;  %5747 = vmatpush3.msra.mxu1 %v749_v43  ;;  %v2016_v42 = vld [vmem:[%s6360_s23 + $0x58] sm:$0xff] }
 0x167   : > { %5737 = vmatprep.subr.mxu0 %v744_v44  ;;  %5748 = vmatprep.subr.mxu1 %v748_v45  ;;  %v2020_v43 = vld [vmem:[%s6360_s23 + $0x78] sm:$0xff] }
 0x168   : > { %5738 = vmatpush3.msra.mxu0 %v744_v44  ;;  %5749 = vmatpush3.msra.mxu1 %v748_v45  ;;  %v2015_v44 = vld [vmem:[%s6360_s23 + $0x50] sm:$0xff] }
 0x169   : > { %5739 = vmatprep.subr.mxu0 %v743_v46  ;;  %5750 = vmatprep.subr.mxu1 %v747_v47  ;;  %v2019_v45 = vld [vmem:[%s6360_s23 + $0x70] sm:$0xff] }
 0x16a   : > { %5740 = vmatpush3.msra.mxu0 %v743_v46  ;;  %5751 = vmatpush3.msra.mxu1 %v747_v47  ;;  %v2014_v46 = vld [vmem:[%s6360_s23 + $0x48] sm:$0xff] }
 0x16b   : > { %5742 = vmatmul.mubr.msk.f32.vlgmr.msra.gmra.mxu0 %vm691_vm1, %v6434_v41  ;;  %5753 = vmatmul.mubr.msk.f32.vlgmr.msra.gmra.mxu1 %vm691_vm1, %v6434_v41  ;;  %v2018_v47 = vld [vmem:[%s6360_s23 + $0x68] sm:$0xff] }
 0x16c   : > { %5755 = vmatprep.subr.mxu0 %v754_v48  ;;  %5766 = vmatprep.subr.mxu1 %v758_v49 }
 0x16d   : > { %5756 = vmatpush3.msra.mxu0 %v754_v48  ;;  %5763 = vmatprep.mubr.msk.f32.mxu0 %vm691_vm1, %v6428_v38  ;;  %v2013_v48 = vld [vmem:[%s6360_s23 + $0x40] sm:$0xff] }
 0x16e   : > { %5767 = vmatpush3.msra.mxu1 %v758_v49  ;;  %5774 = vmatprep.mubr.msk.f32.mxu1 %vm691_vm1, %v6428_v38  ;;  %v2017_v49 = vld [vmem:[%s6360_s23 + $0x60] sm:$0xff] }
 0x16f   : > { %5757 = vmatprep.subr.mxu0 %v753_v50  ;;  %5768 = vmatprep.subr.mxu1 %v757_v51 }
 0x170   : > { %5758 = vmatpush3.msra.mxu0 %v753_v50  ;;  %5769 = vmatpush3.msra.mxu1 %v757_v51  ;;  %v2024_v50 = vld [vmem:[%s6360_s23 + $0x98] sm:$0xff] }
 0x171   : > { %5759 = vmatprep.subr.mxu0 %v752_v52  ;;  %5770 = vmatprep.subr.mxu1 %v756_v53  ;;  %v2028_v51 = vld [vmem:[%s6360_s23 + $0xb8] sm:$0xff] }
 0x172   : > { %5760 = vmatpush3.msra.mxu0 %v752_v52  ;;  %5771 = vmatpush3.msra.mxu1 %v756_v53  ;;  %v2023_v52 = vld [vmem:[%s6360_s23 + $0x90] sm:$0xff] }
 0x173   : > { %5761 = vmatprep.subr.mxu0 %v751_v54  ;;  %5772 = vmatprep.subr.mxu1 %v755_v55  ;;  %v2027_v53 = vld [vmem:[%s6360_s23 + $0xb0] sm:$0xff] }
 0x174   : > { %5762 = vmatpush3.msra.mxu0 %v751_v54  ;;  %5773 = vmatpush3.msra.mxu1 %v755_v55  ;;  %v2022_v54 = vld [vmem:[%s6360_s23 + $0x88] sm:$0xff] }
 0x175   : > { %5764 = vmatmul.mubr.msk.f32.vlgmr.msra.gmra.mxu0 %vm691_vm1, %v6434_v41  ;;  %5775 = vmatmul.mubr.msk.f32.vlgmr.msra.gmra.mxu1 %vm691_vm1, %v6434_v41  ;;  %v2026_v55 = vld [vmem:[%s6360_s23 + $0xa8] sm:$0xff] }
 0x176   : > { %5777 = vmatprep.subr.mxu0 %v762_v56  ;;  %5788 = vmatprep.subr.mxu1 %v766_v57 }
 0x177   : > { %5778 = vmatpush3.msra.mxu0 %v762_v56  ;;  %5785 = vmatprep.mubr.msk.f32.mxu0 %vm691_vm1, %v6428_v38  ;;  %v2021_v56 = vld [vmem:[%s6360_s23 + $0x80] sm:$0xff] }
 0x178   : > { %5789 = vmatpush3.msra.mxu1 %v766_v57  ;;  %5796 = vmatprep.mubr.msk.f32.mxu1 %vm691_vm1, %v6428_v38  ;;  %v2025_v57 = vld [vmem:[%s6360_s23 + $0xa0] sm:$0xff] }
 0x179   : > { %5779 = vmatprep.subr.mxu0 %v761_v58  ;;  %5790 = vmatprep.subr.mxu1 %v765_v59 }
 0x17a   : > { %5780 = vmatpush3.msra.mxu0 %v761_v58  ;;  %5791 = vmatpush3.msra.mxu1 %v765_v59  ;;  %v2032_v58 = vld [vmem:[%s6360_s23 + $0xd8] sm:$0xff] }
 0x17b   : > { %5781 = vmatprep.subr.mxu0 %v760_v60  ;;  %5792 = vmatprep.subr.mxu1 %v764_v61  ;;  %v2036_v59 = vld [vmem:[%s6360_s23 + $0xf8] sm:$0xff] }
 0x17c   : > { %5782 = vmatpush3.msra.mxu0 %v760_v60  ;;  %5793 = vmatpush3.msra.mxu1 %v764_v61  ;;  %v2031_v60 = vld [vmem:[%s6360_s23 + $0xd0] sm:$0xff] }
 0x17d   : > { %5783 = vmatprep.subr.mxu0 %v759_v62  ;;  %5794 = vmatprep.subr.mxu1 %v763_v63  ;;  %v2035_v61 = vld [vmem:[%s6360_s23 + $0xf0] sm:$0xff] }
 0x17e   : > { %5784 = vmatpush3.msra.mxu0 %v759_v62  ;;  %5795 = vmatpush3.msra.mxu1 %v763_v63  ;;  %v2030_v62 = vld [vmem:[%s6360_s23 + $0xc8] sm:$0xff] }
 0x17f   : > { %5786 = vmatmul.mubr.msk.f32.vlgmr.msra.gmra.mxu0 %vm691_vm1, %v6434_v41  ;;  %5797 = vmatmul.mubr.msk.f32.vlgmr.msra.gmra.mxu1 %vm691_vm1, %v6434_v41  ;;  %v2034_v63 = vld [vmem:[%s6360_s23 + $0xe8] sm:$0xff] }
 0x180   : > { %5799 = vmatprep.subr.mxu0 %v1376_v0  ;;  %5810 = vmatprep.subr.mxu1 %v1380_v1 }
 0x181   : > { %5800 = vmatpush3.msra.mxu0 %v1376_v0  ;;  %5807 = vmatprep.mubr.msk.f32.mxu0 %vm691_vm1, %v6428_v38  ;;  %v2029_v0 = vld [vmem:[%s6360_s23 + $0xc0] sm:$0xff] }
 0x182   : > { %5811 = vmatpush3.msra.mxu1 %v1380_v1  ;;  %5818 = vmatprep.mubr.msk.f32.mxu1 %vm691_vm1, %v6428_v38  ;;  %v2033_v1 = vld [vmem:[%s6360_s23 + $0xe0] sm:$0xff] }
 0x183   : > { %5801 = vmatprep.subr.mxu0 %v1375_v2  ;;  %5812 = vmatprep.subr.mxu1 %v1379_v3 }
 0x184   : > { %5802 = vmatpush3.msra.mxu0 %v1375_v2  ;;  %5813 = vmatpush3.msra.mxu1 %v1379_v3 }
 0x185   : > { %5803 = vmatprep.subr.mxu0 %v1374_v4  ;;  %5814 = vmatprep.subr.mxu1 %v1378_v5 }
 0x186   : > { %5804 = vmatpush3.msra.mxu0 %v1374_v4  ;;  %5815 = vmatpush3.msra.mxu1 %v1378_v5 }
 0x187   : > { %5805 = vmatprep.subr.mxu0 %v1373_v6  ;;  %5816 = vmatprep.subr.mxu1 %v1377_v7 }
 0x188   : > { %5806 = vmatpush3.msra.mxu0 %v1373_v6  ;;  %5817 = vmatpush3.msra.mxu1 %v1377_v7 }
 0x189   : > { %5808 = vmatmul.mubr.msk.f32.vlgmr.msra.gmra.mxu0 %vm691_vm1, %v6434_v41  ;;  %5819 = vmatmul.mubr.msk.f32.vlgmr.msra.gmra.mxu1 %vm691_vm1, %v6434_v41 }
 0x18a   : > { %5821 = vmatprep.subr.mxu0 %v1384_v8  ;;  %5832 = vmatprep.subr.mxu1 %v1388_v9 }
 0x18b   : > { %5822 = vmatpush3.msra.mxu0 %v1384_v8  ;;  %5829 = vmatprep.mubr.msk.f32.mxu0 %vm691_vm1, %v6428_v38 }
 0x18c   : > { %5833 = vmatpush3.msra.mxu1 %v1388_v9  ;;  %5840 = vmatprep.mubr.msk.f32.mxu1 %vm691_vm1, %v6428_v38 }
 0x18d   : > { %5823 = vmatprep.subr.mxu0 %v1383_v10  ;;  %5834 = vmatprep.subr.mxu1 %v1387_v11 }
 0x18e   : > { %5824 = vmatpush3.msra.mxu0 %v1383_v10  ;;  %5835 = vmatpush3.msra.mxu1 %v1387_v11 }
 0x18f   : > { %5825 = vmatprep.subr.mxu0 %v1382_v12  ;;  %5836 = vmatprep.subr.mxu1 %v1386_v13 }
 0x190   : > { %5826 = vmatpush3.msra.mxu0 %v1382_v12  ;;  %5837 = vmatpush3.msra.mxu1 %v1386_v13 }
 0x191   : > { %5827 = vmatprep.subr.mxu0 %v1381_v14  ;;  %5838 = vmatprep.subr.mxu1 %v1385_v15 }
 0x192   : > { %5828 = vmatpush3.msra.mxu0 %v1381_v14  ;;  %5839 = vmatpush3.msra.mxu1 %v1385_v15 }
 0x193   : > { %5830 = vmatmul.mubr.msk.f32.vlgmr.msra.gmra.mxu0 %vm691_vm1, %v6434_v41  ;;  %5841 = vmatmul.mubr.msk.f32.vlgmr.msra.gmra.mxu1 %vm691_vm1, %v6434_v41 }
 0x194   : > { %5843 = vmatprep.subr.mxu0 %v1392_v16  ;;  %5854 = vmatprep.subr.mxu1 %v1396_v17 }
 0x195   : > { %5844 = vmatpush3.msra.mxu0 %v1392_v16  ;;  %5851 = vmatprep.mubr.msk.f32.mxu0 %vm691_vm1, %v6428_v38 }
 0x196   : > { %5855 = vmatpush3.msra.mxu1 %v1396_v17  ;;  %5862 = vmatprep.mubr.msk.f32.mxu1 %vm691_vm1, %v6428_v38 }
 0x197   : > { %5845 = vmatprep.subr.mxu0 %v1391_v18  ;;  %5856 = vmatprep.subr.mxu1 %v1395_v19 }
 0x198   : > { %5846 = vmatpush3.msra.mxu0 %v1391_v18  ;;  %5857 = vmatpush3.msra.mxu1 %v1395_v19 }
 0x199   : > { %5847 = vmatprep.subr.mxu0 %v1390_v20  ;;  %5858 = vmatprep.subr.mxu1 %v1394_v21 }
 0x19a   : > { %5848 = vmatpush3.msra.mxu0 %v1390_v20  ;;  %5859 = vmatpush3.msra.mxu1 %v1394_v21 }
 0x19b   : > { %5849 = vmatprep.subr.mxu0 %v1389_v22  ;;  %5860 = vmatprep.subr.mxu1 %v1393_v23 }
 0x19c   : > { %5850 = vmatpush3.msra.mxu0 %v1389_v22  ;;  %5861 = vmatpush3.msra.mxu1 %v1393_v23 }
 0x19d   : > { %5852 = vmatmul.mubr.msk.f32.vlgmr.msra.gmra.mxu0 %vm691_vm1, %v6434_v41  ;;  %5863 = vmatmul.mubr.msk.f32.vlgmr.msra.gmra.mxu1 %vm691_vm1, %v6434_v41 }
 0x19e   : > { %5865 = vmatprep.subr.mxu0 %v1400_v24  ;;  %5876 = vmatprep.subr.mxu1 %v1404_v25 }
 0x19f   : > { %5866 = vmatpush3.msra.mxu0 %v1400_v24  ;;  %5873 = vmatprep.mubr.msk.f32.mxu0 %vm691_vm1, %v6428_v38 }
 0x1a0   : > { %5877 = vmatpush3.msra.mxu1 %v1404_v25  ;;  %5884 = vmatprep.mubr.msk.f32.mxu1 %vm691_vm1, %v6428_v38 }
 0x1a1   : > { %5867 = vmatprep.subr.mxu0 %v1399_v26  ;;  %5878 = vmatprep.subr.mxu1 %v1403_v27 }
 0x1a2   : > { %5868 = vmatpush3.msra.mxu0 %v1399_v26  ;;  %5879 = vmatpush3.msra.mxu1 %v1403_v27 }
 0x1a3   : > { %5869 = vmatprep.subr.mxu0 %v1398_v28  ;;  %5880 = vmatprep.subr.mxu1 %v1402_v29 }
 0x1a4   : > { %5870 = vmatpush3.msra.mxu0 %v1398_v28  ;;  %5881 = vmatpush3.msra.mxu1 %v1402_v29 }
 0x1a5   : > { %5871 = vmatprep.subr.mxu0 %v1397_v30  ;;  %5882 = vmatprep.subr.mxu1 %v1401_v31 }
 0x1a6   : > { %5872 = vmatpush3.msra.mxu0 %v1397_v30  ;;  %5883 = vmatpush3.msra.mxu1 %v1401_v31 }
 0x1a7   : > { %5874 = vmatmul.mubr.msk.f32.vlgmr.msra.gmra.mxu0 %vm691_vm1, %v6434_v41  ;;  %5885 = vmatmul.mubr.msk.f32.vlgmr.msra.gmra.mxu1 %vm691_vm1, %v6434_v41 }
 0x1a8   : > { %5887 = vmatprep.subr.mxu0 %v2008_v32  ;;  %5898 = vmatprep.subr.mxu1 %v2012_v33 }
 0x1a9   : > { %5888 = vmatpush3.msra.mxu0 %v2008_v32  ;;  %5895 = vmatprep.mubr.msk.f32.mxu0 %vm691_vm1, %v6428_v38 }
 0x1aa   : > { %5899 = vmatpush3.msra.mxu1 %v2012_v33  ;;  %5906 = vmatprep.mubr.msk.f32.mxu1 %vm691_vm1, %v6428_v38 }
 0x1ab   : > { %5889 = vmatprep.subr.mxu0 %v2007_v34  ;;  %5900 = vmatprep.subr.mxu1 %v2011_v35 }
 0x1ac   : > { %5890 = vmatpush3.msra.mxu0 %v2007_v34  ;;  %5901 = vmatpush3.msra.mxu1 %v2011_v35 }
 0x1ad   : > { %5891 = vmatprep.subr.mxu0 %v2006_v36  ;;  %5902 = vmatprep.subr.mxu1 %v2010_v37 }
 0x1ae   : > { %5892 = vmatpush3.msra.mxu0 %v2006_v36  ;;  %5903 = vmatpush3.msra.mxu1 %v2010_v37 }
 0x1af   : > { %5893 = vmatprep.subr.mxu0 %v2005_v39  ;;  %5904 = vmatprep.subr.mxu1 %v2009_v40 }
 0x1b0   : > { %5894 = vmatpush3.msra.mxu0 %v2005_v39  ;;  %5905 = vmatpush3.msra.mxu1 %v2009_v40 }
 0x1b1   : > { %5896 = vmatmul.mubr.msk.f32.vlgmr.msra.gmra.mxu0 %vm691_vm1, %v6434_v41  ;;  %5907 = vmatmul.mubr.msk.f32.vlgmr.msra.gmra.mxu1 %vm691_vm1, %v6434_v41 }
 0x1b2   : > { %5909 = vmatprep.subr.mxu0 %v2016_v42  ;;  %5920 = vmatprep.subr.mxu1 %v2020_v43 }
 0x1b3   : > { %5910 = vmatpush3.msra.mxu0 %v2016_v42  ;;  %5917 = vmatprep.mubr.msk.f32.mxu0 %vm691_vm1, %v6428_v38 }
 0x1b4   : > { %5921 = vmatpush3.msra.mxu1 %v2020_v43  ;;  %5928 = vmatprep.mubr.msk.f32.mxu1 %vm691_vm1, %v6428_v38 }
 0x1b5   : > { %5911 = vmatprep.subr.mxu0 %v2015_v44  ;;  %5922 = vmatprep.subr.mxu1 %v2019_v45 }
 0x1b6   : > { %5912 = vmatpush3.msra.mxu0 %v2015_v44  ;;  %5923 = vmatpush3.msra.mxu1 %v2019_v45 }
 0x1b7   : > { %5913 = vmatprep.subr.mxu0 %v2014_v46  ;;  %5924 = vmatprep.subr.mxu1 %v2018_v47 }
 0x1b8   : > { %5914 = vmatpush3.msra.mxu0 %v2014_v46  ;;  %5925 = vmatpush3.msra.mxu1 %v2018_v47 }
 0x1b9   : > { %5915 = vmatprep.subr.mxu0 %v2013_v48  ;;  %5926 = vmatprep.subr.mxu1 %v2017_v49 }
 0x1ba   : > { %5916 = vmatpush3.msra.mxu0 %v2013_v48  ;;  %5927 = vmatpush3.msra.mxu1 %v2017_v49 }
 0x1bb   : > { %5918 = vmatmul.mubr.msk.f32.vlgmr.msra.gmra.mxu0 %vm691_vm1, %v6434_v41  ;;  %5929 = vmatmul.mubr.msk.f32.vlgmr.msra.gmra.mxu1 %vm691_vm1, %v6434_v41 }
 0x1bc   : > { %5931 = vmatprep.subr.mxu0 %v2024_v50  ;;  %5942 = vmatprep.subr.mxu1 %v2028_v51 }
 0x1bd   : > { %5932 = vmatpush3.msra.mxu0 %v2024_v50  ;;  %5939 = vmatprep.mubr.msk.f32.mxu0 %vm691_vm1, %v6428_v38 }
 0x1be   : > { %5943 = vmatpush3.msra.mxu1 %v2028_v51  ;;  %5950 = vmatprep.mubr.msk.f32.mxu1 %vm691_vm1, %v6428_v38 }
 0x1bf   : > { %5933 = vmatprep.subr.mxu0 %v2023_v52  ;;  %5944 = vmatprep.subr.mxu1 %v2027_v53 }
 0x1c0   : > { %5934 = vmatpush3.msra.mxu0 %v2023_v52  ;;  %5945 = vmatpush3.msra.mxu1 %v2027_v53  ;;  %v6697_v52 = vld [vmem:[%s7078_s21 + $0x8] sm:$0xff] }
 0x1c1   : > { %5935 = vmatprep.subr.mxu0 %v2022_v54  ;;  %5946 = vmatprep.subr.mxu1 %v2026_v55 }
 0x1c2   : > { %5936 = vmatpush3.msra.mxu0 %v2022_v54  ;;  %5947 = vmatpush3.msra.mxu1 %v2026_v55 }
 0x1c3   : > { %5937 = vmatprep.subr.mxu0 %v2021_v56  ;;  %5948 = vmatprep.subr.mxu1 %v2025_v57 }
 0x1c4   : > { %5938 = vmatpush3.msra.mxu0 %v2021_v56  ;;  %5949 = vmatpush3.msra.mxu1 %v2025_v57  ;;  %v6702_v57 = vld [vmem:[%s7078_s21] sm:$0xff] }
 0x1c5   : > { %5940 = vmatmul.mubr.msk.f32.vlgmr.msra.gmra.mxu0 %vm691_vm1, %v6434_v41  ;;  %5951 = vmatmul.mubr.msk.f32.vlgmr.msra.gmra.mxu1 %vm691_vm1, %v6434_v41 }
 0x1c6   : > { %5953 = vmatprep.subr.mxu0 %v2032_v58  ;;  %5964 = vmatprep.subr.mxu1 %v2036_v59 }
 0x1c7   : > { %5954 = vmatpush3.msra.mxu0 %v2032_v58  ;;  %5961 = vmatprep.mubr.msk.f32.mxu0 %vm691_vm1, %v6428_v38 }
 0x1c8   : > { %5965 = vmatpush3.msra.mxu1 %v2036_v59  ;;  %5972 = vmatprep.mubr.msk.f32.mxu1 %vm691_vm1, %v6428_v38 }
 0x1c9   : > { %5955 = vmatprep.subr.mxu0 %v2031_v60  ;;  %5966 = vmatprep.subr.mxu1 %v2035_v61 }
 0x1ca   : > { %5956 = vmatpush3.msra.mxu0 %v2031_v60  ;;  %5967 = vmatpush3.msra.mxu1 %v2035_v61 }
 0x1cb   : > { %5957 = vmatprep.subr.mxu0 %v2030_v62  ;;  %5968 = vmatprep.subr.mxu1 %v2034_v63 }
 0x1cc   : > { %5958 = vmatpush3.msra.mxu0 %v2030_v62  ;;  %5969 = vmatpush3.msra.mxu1 %v2034_v63 }
 0x1cd   : > { %5959 = vmatprep.subr.mxu0 %v2029_v0  ;;  %5970 = vmatprep.subr.mxu1 %v2033_v1 }
 0x1ce   : > { %5960 = vmatpush3.msra.mxu0 %v2029_v0  ;;  %5971 = vmatpush3.msra.mxu1 %v2033_v1 }
 0x1cf   : > { %5962 = vmatmul.mubr.msk.f32.vlgmr.msra.gmra.mxu0 %vm691_vm1, %v6434_v41  ;;  %5973 = vmatmul.mubr.msk.f32.vlgmr.msra.gmra.mxu1 %vm691_vm1, %v6434_v41 }
 0x222   : > { %v5721_v38 = vpop.f32.mrf.mxu0  ;;  %v5732_v2 = vpop.f32.mrf.mxu1 }
 0x224   : > { %v839_v3 = vpop.f32.mrf.mxu0  ;;  %v914_v4 = vpop.f32.mrf.mxu1 }
 0x225   : > { %5979 = vmatprep.mubr.msk.f32.mxu0 %vm2637_vm2, %v839_v3  ;;  %5986 = vmatprep.mubr.msk.f32.mxu1 %vm2637_vm2, %v914_v4 }
 0x22b   : > { %v5743_v5 = vpop.f32.mrf.mxu0  ;;  %v5754_v6 = vpop.f32.mrf.mxu1 }
 0x22d   : > { %v989_v7 = vpop.f32.mrf.mxu0  ;;  %v1064_v8 = vpop.f32.mrf.mxu1 }
 0x235   : > { %v5765_v9 = vpop.f32.mrf.mxu0  ;;  %v5776_v10 = vpop.f32.mrf.mxu1 }
 0x237   : > { %v1139_v11 = vpop.f32.mrf.mxu0  ;;  %v1214_v12 = vpop.f32.mrf.mxu1 }
 0x23f   : > { %v6616_v13 = vpop.f32.mrf.mxu0  ;;  %v6618_v41 = vpop.f32.mrf.mxu1 }
 0x241   : > { %v1289_v14 = vpop.f32.mrf.mxu0  ;;  %v1364_v15 = vpop.f32.mrf.mxu1 }
 0x249   : > { %v5809_v16 = vpop.f32.mrf.mxu0  ;;  %v5820_v17 = vpop.f32.mrf.mxu1 }
 0x24a   : > { %5975 = vmatprep.subr.msk.mxu0 %vm2637_vm2, %v5809_v16  ;;  %5982 = vmatprep.subr.msk.mxu1 %vm2637_vm2, %v5820_v17 }
 0x24b   : > { %v1471_v18 = vpop.f32.mrf.mxu0  ;;  %v1546_v19 = vpop.f32.mrf.mxu1  ;;  %5976 = vmatpush3.xpose.msk.msra.mxu0 %vm2637_vm2, %v5809_v16  ;;  %5983 = vmatpush3.xpose.msk.msra.mxu1 %vm2637_vm2, %v5820_v17 }
 0x24c   : > { %5977 = vmatprep.subr.msk.mxu0 %vm2637_vm2, %v1471_v18  ;;  %5984 = vmatprep.subr.msk.mxu1 %vm2637_vm2, %v1546_v19 }
 0x24f   : > { %5978 = vmatpush3.xpose.msk.msra.mxu0 %vm2637_vm2, %v1471_v18  ;;  %5985 = vmatpush3.xpose.msk.msra.mxu1 %vm2637_vm2, %v1546_v19 }
 0x252   : > { %5980 = vmatmul.mubr.msk.f32.vlgmr.msra.gmra.mxu0 %vm2637_vm2, %v5721_v38  ;;  %5987 = vmatmul.mubr.msk.f32.vlgmr.msra.gmra.mxu1 %vm2637_vm2, %v5732_v2 }
 0x253   : > { %v5831_v20 = vpop.f32.mrf.mxu0  ;;  %v5842_v21 = vpop.f32.mrf.mxu1  ;;  %5993 = vmatprep.mubr.msk.f32.mxu0 %vm2637_vm2, %v989_v7  ;;  %6000 = vmatprep.mubr.msk.f32.mxu1 %vm2637_vm2, %v1064_v8 }
 0x254   : > { %5989 = vmatprep.subr.msk.mxu0 %vm2637_vm2, %v5831_v20  ;;  %5996 = vmatprep.subr.msk.mxu1 %vm2637_vm2, %v5842_v21 }
 0x255   : > { %v1621_v22 = vpop.f32.mrf.mxu0  ;;  %v1696_v23 = vpop.f32.mrf.mxu1  ;;  %5990 = vmatpush3.xpose.msk.msra.mxu0 %vm2637_vm2, %v5831_v20  ;;  %5997 = vmatpush3.xpose.msk.msra.mxu1 %vm2637_vm2, %v5842_v21 }
 0x256   : > { %5991 = vmatprep.subr.msk.mxu0 %vm2637_vm2, %v1621_v22  ;;  %5998 = vmatprep.subr.msk.mxu1 %vm2637_vm2, %v1696_v23 }
 0x259   : > { %5992 = vmatpush3.xpose.msk.msra.mxu0 %vm2637_vm2, %v1621_v22  ;;  %5999 = vmatpush3.xpose.msk.msra.mxu1 %vm2637_vm2, %v1696_v23 }
 0x25c   : > { %5994 = vmatmul.mubr.msk.f32.vlgmr.msra.gmra.mxu0 %vm2637_vm2, %v5743_v5  ;;  %6001 = vmatmul.mubr.msk.f32.vlgmr.msra.gmra.mxu1 %vm2637_vm2, %v5754_v6 }
 0x25d   : > { %v5853_v24 = vpop.f32.mrf.mxu0  ;;  %v5864_v25 = vpop.f32.mrf.mxu1  ;;  %6007 = vmatprep.mubr.msk.f32.mxu0 %vm2637_vm2, %v1139_v11  ;;  %6014 = vmatprep.mubr.msk.f32.mxu1 %vm2637_vm2, %v1214_v12 }
 0x25e   : > { %6003 = vmatprep.subr.msk.mxu0 %vm2637_vm2, %v5853_v24  ;;  %6010 = vmatprep.subr.msk.mxu1 %vm2637_vm2, %v5864_v25 }
 0x25f   : > { %v1771_v26 = vpop.f32.mrf.mxu0  ;;  %v1846_v27 = vpop.f32.mrf.mxu1  ;;  %6004 = vmatpush3.xpose.msk.msra.mxu0 %vm2637_vm2, %v5853_v24  ;;  %6011 = vmatpush3.xpose.msk.msra.mxu1 %vm2637_vm2, %v5864_v25 }
 0x260   : > { %6005 = vmatprep.subr.msk.mxu0 %vm2637_vm2, %v1771_v26  ;;  %6012 = vmatprep.subr.msk.mxu1 %vm2637_vm2, %v1846_v27 }
 0x263   : > { %6006 = vmatpush3.xpose.msk.msra.mxu0 %vm2637_vm2, %v1771_v26  ;;  %6013 = vmatpush3.xpose.msk.msra.mxu1 %vm2637_vm2, %v1846_v27 }
 0x266   : > { %6008 = vmatmul.mubr.msk.f32.vlgmr.msra.gmra.mxu0 %vm2637_vm2, %v5765_v9  ;;  %6015 = vmatmul.mubr.msk.f32.vlgmr.msra.gmra.mxu1 %vm2637_vm2, %v5776_v10 }
 0x267   : > { %v5875_v28 = vpop.f32.mrf.mxu0  ;;  %v5886_v29 = vpop.f32.mrf.mxu1  ;;  %6021 = vmatprep.mubr.msk.f32.mxu0 %vm2637_vm2, %v1289_v14  ;;  %6028 = vmatprep.mubr.msk.f32.mxu1 %vm2637_vm2, %v1364_v15 }
 0x268   : > { %6017 = vmatprep.subr.msk.mxu0 %vm2637_vm2, %v5875_v28  ;;  %6024 = vmatprep.subr.msk.mxu1 %vm2637_vm2, %v5886_v29 }
 0x269   : > { %v1921_v30 = vpop.f32.mrf.mxu0  ;;  %v1996_v31 = vpop.f32.mrf.mxu1  ;;  %6018 = vmatpush3.xpose.msk.msra.mxu0 %vm2637_vm2, %v5875_v28  ;;  %6025 = vmatpush3.xpose.msk.msra.mxu1 %vm2637_vm2, %v5886_v29 }
 0x26a   : > { %6019 = vmatprep.subr.msk.mxu0 %vm2637_vm2, %v1921_v30  ;;  %6026 = vmatprep.subr.msk.mxu1 %vm2637_vm2, %v1996_v31 }
 0x26d   : > { %6020 = vmatpush3.xpose.msk.msra.mxu0 %vm2637_vm2, %v1921_v30  ;;  %6027 = vmatpush3.xpose.msk.msra.mxu1 %vm2637_vm2, %v1996_v31 }
 0x270   : > { %6022 = vmatmul.mubr.msk.f32.vlgmr.msra.gmra.mxu0 %vm2637_vm2, %v6616_v13  ;;  %6029 = vmatmul.mubr.msk.f32.vlgmr.msra.gmra.mxu1 %vm2637_vm2, %v6618_v41 }
 0x271   : > { %v5897_v32 = vpop.f32.mrf.mxu0  ;;  %v6668_v34 = vpop.f32.mrf.mxu1 }
 0x272   : > { %6031 = vmatprep.subr.mxu0 %v5897_v32 }
 0x273   : > { %v2103_v33 = vpop.f32.mrf.mxu0  ;;  %6032 = vmatpush3.msra.mxu0 %v5897_v32  ;;  %v6671_v35 = vpop.f32.mrf.mxu1 }
 0x274   : > { %6033 = vmatprep.subr.mxu0 %v2103_v33 }
 0x275   : > { %6034 = vmatpush3.msra.mxu0 %v2103_v33 }
 0x276   : > { %6038 = vmatprep.subr.mxu0 %v6668_v34 }
 0x27b   : > { %v5930_v36 = vpop.f32.mrf.mxu1  ;;  %v6676_v40 = vpop.f32.mrf.mxu0 }
 0x27c   : > { %6052 = vmatprep.subr.mxu1 %v5930_v36 }
 0x27d   : > { %v2328_v37 = vpop.f32.mrf.mxu1  ;;  %6053 = vmatpush3.msra.mxu1 %v5930_v36  ;;  %v6678_v42 = vpop.f32.mrf.mxu0 }
 0x27e   : > { %6054 = vmatprep.subr.mxu1 %v2328_v37 }
 0x27f   : > { %6055 = vmatpush3.msra.mxu1 %v2328_v37 }
 0x285   : > { %v6673_v39 = vpop.f32.mrf.mxu1  ;;  %v6680_v43 = vpop.f32.mrf.mxu0 }
 0x286   : > { %6066 = vmatprep.subr.mxu1 %v6673_v39 }
 0x287   : > { %v6682_v44 = vpop.f32.mrf.mxu0  ;;  %v6684_v45 = vpop.f32.mrf.mxu1 }
 0x28f   : > { %v6686_v46 = vpop.f32.mrf.mxu0  ;;  %v6688_v47 = vpop.f32.mrf.mxu1 }
 0x291   : > { %v6690_v48 = vpop.f32.mrf.mxu0  ;;  %v6692_v49 = vpop.f32.mrf.mxu1 }
 0x312   : > { %v5981_v50 = vpop.f32.mrf.mxu0  ;;  %v5988_v51 = vpop.f32.mrf.mxu1 }
 0x313   : > { %v3335_v53 = vmul.f32 0.5, %v5981_v50  ;;  %v3337_v54 = vmul.f32 0.5, %v5988_v51 }
 0x314   : > { %v2716_v55 = vpop.f32.mrf.mxu0  ;;  %v2803_v56 = vpop.f32.mrf.mxu1 }
 0x315   : > { %v3334_v58 = vmul.f32 0.5, %v2716_v55  ;;  %v3336_v59 = vmul.f32 0.5, %v2803_v56  ;;  %v6705_v60 = vadd.f32 %v6697_v52, %v3335_v53  ;;  %v6713_v63 = vadd.f32 %v6697_v52, %v3337_v54 }
 0x317   : > { %v3372_v61 = vsel %vm3368_vm3, %v6705_v60, -inf  ;;  %v6710_v62 = vadd.f32 %v6702_v57, %v3334_v58  ;;  %v6718_v1 = vadd.f32 %v6702_v57, %v3336_v59  ;;  %v3378_v38 = vsel %vm3368_vm3, %v6713_v63, -inf }
 0x318   : > { %3373 = vmax.xlane.f32.xlu1 %v3372_v61 }
 0x319   : > { %v3369_v0 = vsel %vm3368_vm3, %v6710_v62, -inf  ;;  %v3375_v6 = vsel %vm3368_vm3, %v6718_v1, -inf }
 0x31a   : > { %3370 = vmax.xlane.f32.xlu0 %v3369_v0 }
 0x31c   : > { %v6002_v2 = vpop.f32.mrf.mxu1  ;;  %v5995_v3 = vpop.f32.mrf.mxu0  ;;  %3379 = vmax.xlane.f32.xlu1 %v3378_v38 }
 0x31d   : > { %v3341_v4 = vmul.f32 0.5, %v6002_v2  ;;  %v3339_v5 = vmul.f32 0.5, %v5995_v3 }
 0x31e   : > { %v2977_v7 = vpop.f32.mrf.mxu1  ;;  %v2890_v8 = vpop.f32.mrf.mxu0  ;;  %3376 = vmax.xlane.f32.xlu0 %v3375_v6 }
 0x31f   : > { %v3340_v9 = vmul.f32 0.5, %v2977_v7  ;;  %v3338_v10 = vmul.f32 0.5, %v2890_v8  ;;  %v6725_v11 = vadd.f32 %v6697_v52, %v3339_v5  ;;  %v6733_v41 = vadd.f32 %v6697_v52, %v3341_v4 }
 0x321   : > { %v3384_v12 = vsel %vm3368_vm3, %v6725_v11, -inf  ;;  %v6730_v13 = vadd.f32 %v6702_v57, %v3338_v10  ;;  %v6738_v15 = vadd.f32 %v6702_v57, %v3340_v9  ;;  %v3390_v16 = vsel %vm3368_vm3, %v6733_v41, -inf }
 0x322   : > { %3385 = vmax.xlane.f32.xlu1 %v3384_v12 }
 0x323   : > { %v3381_v14 = vsel %vm3368_vm3, %v6730_v13, -inf  ;;  %v3387_v21 = vsel %vm3368_vm3, %v6738_v15, -inf }
 0x324   : > { %3382 = vmax.xlane.f32.xlu0 %v3381_v14 }
 0x326   : > { %v6016_v17 = vpop.f32.mrf.mxu1  ;;  %v6009_v18 = vpop.f32.mrf.mxu0  ;;  %3391 = vmax.xlane.f32.xlu1 %v3390_v16 }
 0x327   : > { %v3345_v19 = vmul.f32 0.5, %v6016_v17  ;;  %v3343_v20 = vmul.f32 0.5, %v6009_v18 }
 0x328   : > { %v3151_v22 = vpop.f32.mrf.mxu1  ;;  %v3064_v23 = vpop.f32.mrf.mxu0  ;;  %3388 = vmax.xlane.f32.xlu0 %v3387_v21 }
 0x329   : > { %v3344_v24 = vmul.f32 0.5, %v3151_v22  ;;  %v3342_v25 = vmul.f32 0.5, %v3064_v23  ;;  %v6745_v26 = vadd.f32 %v6697_v52, %v3343_v20  ;;  %v6753_v29 = vadd.f32 %v6697_v52, %v3345_v19 }
 0x32b   : > { %v3396_v27 = vsel %vm3368_vm3, %v6745_v26, -inf  ;;  %v6750_v28 = vadd.f32 %v6702_v57, %v3342_v25  ;;  %v6758_v31 = vadd.f32 %v6702_v57, %v3344_v24  ;;  %v3402_v32 = vsel %vm3368_vm3, %v6753_v29, -inf }
 0x32c   : > { %3397 = vmax.xlane.f32.xlu1 %v3396_v27 }
 0x32d   : > { %v3393_v30 = vsel %vm3368_vm3, %v6750_v28, -inf  ;;  %v3399_v51 = vsel %vm3368_vm3, %v6758_v31, -inf }
 0x32e   : > { %3394 = vmax.xlane.f32.xlu0 %v3393_v30 }
 0x330   : > { %v6030_v33 = vpop.f32.mrf.mxu1  ;;  %v6023_v36 = vpop.f32.mrf.mxu0  ;;  %3403 = vmax.xlane.f32.xlu1 %v3402_v32 }
 0x331   : > { %v3349_v37 = vmul.f32 0.5, %v6030_v33  ;;  %v3347_v50 = vmul.f32 0.5, %v6023_v36 }
 0x332   : > { %v3325_v53 = vpop.f32.mrf.mxu1  ;;  %v3238_v54 = vpop.f32.mrf.mxu0  ;;  %3400 = vmax.xlane.f32.xlu0 %v3399_v51 }
 0x333   : > { %v3348_v55 = vmul.f32 0.5, %v3325_v53  ;;  %v3346_v56 = vmul.f32 0.5, %v3238_v54  ;;  %v6765_v58 = vadd.f32 %v6697_v52, %v3347_v50  ;;  %v6773_v0 = vadd.f32 %v6697_v52, %v3349_v37 }
 0x335   : > { %v3408_v59 = vsel %vm3368_vm3, %v6765_v58, -inf  ;;  %v6770_v61 = vadd.f32 %v6702_v57, %v3346_v56  ;;  %v6778_v2 = vadd.f32 %v6702_v57, %v3348_v55  ;;  %v3414_v3 = vsel %vm3368_vm3, %v6773_v0, -inf }
 0x336   : > { %3409 = vmax.xlane.f32.xlu1 %v3408_v59 }
 0x337   : > { %v3405_v38 = vsel %vm3368_vm3, %v6770_v61, -inf  ;;  %v3411_v4 = vsel %vm3368_vm3, %v6778_v2, -inf }
 0x338   : > { %3406 = vmax.xlane.f32.xlu0 %v3405_v38 }
 0x33a   : > { %3415 = vmax.xlane.f32.xlu1 %v3414_v3 }
 0x33c   : > { %3412 = vmax.xlane.f32.xlu0 %v3411_v4 }
 0x3a1   : > { %v3374_v5 = vpop.xlane.xlu1 %3373 }
 0x3a2   : > { %v3418_v52 = vsub.f32 %v6705_v60, %v3374_v5 }
 0x3a3   : > { %v3371_v6 = vpop.xlane.xlu0 %3370 }
 0x3a4   : > { %v3435_v7 = vmul.f32 1.442695, %v3418_v52  ;;  %v3417_v8 = vsub.f32 %v6710_v62, %v3371_v6 }
 0x3a5   : > { %v3380_v9 = vpop.xlane.xlu1 %3379 }
 0x3a6   : > { %6169 = vpow2.f32 %v3435_v7  ;;  %v3433_v57 = vmul.f32 1.442695, %v3417_v8  ;;  %v3420_v10 = vsub.f32 %v6713_v63, %v3380_v9 }
 0x3a7   : > { %v3377_v12 = vpop.xlane.xlu0 %3376 }
 0x3a8   : > { %6171 = vpow2.f32 %v3433_v57  ;;  %v3439_v14 = vmul.f32 1.442695, %v3420_v10  ;;  %v3419_v16 = vsub.f32 %v6718_v1, %v3377_v12 }
 0x3aa   : > { %6173 = vpow2.f32 %v3439_v14  ;;  %v3437_v17 = vmul.f32 1.442695, %v3419_v16 }
 0x3ab   : > { %v3386_v18 = vpop.xlane.xlu1 %3385 }
 0x3ac   : > { %6175 = vpow2.f32 %v3437_v17  ;;  %v3422_v60 = vsub.f32 %v6725_v11, %v3386_v18 }
 0x3ad   : > { %v3383_v19 = vpop.xlane.xlu0 %3382 }
 0x3ae   : > { %v3443_v20 = vmul.f32 1.442695, %v3422_v60  ;;  %v3421_v62 = vsub.f32 %v6730_v13, %v3383_v19 }
 0x3af   : > { %v3392_v21 = vpop.xlane.xlu1 %3391 }
 0x3b0   : > { %6177 = vpow2.f32 %v3443_v20  ;;  %v3441_v22 = vmul.f32 1.442695, %v3421_v62  ;;  %v3424_v63 = vsub.f32 %v6733_v41, %v3392_v21 }
 0x3b1   : > { %v3389_v23 = vpop.xlane.xlu0 %3388 }
 0x3b2   : > { %6179 = vpow2.f32 %v3441_v22  ;;  %v3447_v24 = vmul.f32 1.442695, %v3424_v63  ;;  %v3423_v1 = vsub.f32 %v6738_v15, %v3389_v23 }
 0x3b3   : > { %v6792_v25 = vpop.eup %6169 }
 0x3b4   : > { %6181 = vpow2.f32 %v3447_v24  ;;  %v3445_v27 = vmul.f32 1.442695, %v3423_v1  ;;  %v3468_v11 = vsel %vm3368_vm3, %v6792_v25, 0.0 }
 0x3b5   : > { %v6796_v30 = vpop.eup %6171  ;;  %v3398_v13 = vpop.xlane.xlu1 %3397  ;;  %3469 = vadd.xlane.f32.xlu1 %v3468_v11 }
 0x3b6   : > { %6183 = vpow2.f32 %v3445_v27  ;;  %v3426_v32 = vsub.f32 %v6745_v26, %v3398_v13  ;;  %v3465_v41 = vsel %vm3368_vm3, %v6796_v30, 0.0 }
 0x3b7   : > { %v6801_v33 = vpop.eup %6173  ;;  %v3395_v15 = vpop.xlane.xlu0 %3394  ;;  %3466 = vadd.xlane.f32.xlu0 %v3465_v41 }
 0x3b8   : > { %v3451_v36 = vmul.f32 1.442695, %v3426_v32  ;;  %v3425_v37 = vsub.f32 %v6750_v28, %v3395_v15  ;;  %v3474_v50 = vsel %vm3368_vm3, %v6801_v33, 0.0 }
 0x3b9   : > { %v6806_v51 = vpop.eup %6175  ;;  %v3404_v53 = vpop.xlane.xlu1 %3403  ;;  %3475 = vadd.xlane.f32.xlu1 %v3474_v50 }
 0x3ba   : > { %6185 = vpow2.f32 %v3451_v36  ;;  %v3449_v54 = vmul.f32 1.442695, %v3425_v37  ;;  %v3428_v26 = vsub.f32 %v6753_v29, %v3404_v53  ;;  %v3471_v55 = vsel %vm3368_vm3, %v6806_v51, 0.0 }
 0x3bb   : > { %v3401_v56 = vpop.xlane.xlu0 %3400  ;;  %3472 = vadd.xlane.f32.xlu0 %v3471_v55 }
 0x3bc   : > { %6187 = vpow2.f32 %v3449_v54  ;;  %v3455_v59 = vmul.f32 1.442695, %v3428_v26  ;;  %v3427_v28 = vsub.f32 %v6758_v31, %v3401_v56 }
 0x3bd   : > { %v6812_v38 = vpop.eup %6177 }
 0x3be   : > { %6189 = vpow2.f32 %v3455_v59  ;;  %v3453_v3 = vmul.f32 1.442695, %v3427_v28  ;;  %v3480_v4 = vsel %vm3368_vm3, %v6812_v38, 0.0 }
 0x3bf   : > { %v6816_v5 = vpop.eup %6179  ;;  %v3410_v52 = vpop.xlane.xlu1 %3409  ;;  %3481 = vadd.xlane.f32.xlu1 %v3480_v4 }
 0x3c0   : > { %6191 = vpow2.f32 %v3453_v3  ;;  %v3430_v29 = vsub.f32 %v6765_v58, %v3410_v52  ;;  %v3477_v6 = vsel %vm3368_vm3, %v6816_v5, 0.0 }
 0x3c1   : > { %v6821_v7 = vpop.eup %6181  ;;  %v3407_v31 = vpop.xlane.xlu0 %3406  ;;  %3478 = vadd.xlane.f32.xlu0 %v3477_v6 }
 0x3c2   : > { %v3459_v8 = vmul.f32 1.442695, %v3430_v29  ;;  %v3429_v9 = vsub.f32 %v6770_v61, %v3407_v31  ;;  %v3486_v57 = vsel %vm3368_vm3, %v6821_v7, 0.0 }
 0x3c3   : > { %v6826_v10 = vpop.eup %6183  ;;  %v3416_v12 = vpop.xlane.xlu1 %3415  ;;  %3487 = vadd.xlane.f32.xlu1 %v3486_v57 }
 0x3c4   : > { %6193 = vpow2.f32 %v3459_v8  ;;  %v3457_v14 = vmul.f32 1.442695, %v3429_v9  ;;  %v3432_v58 = vsub.f32 %v6773_v0, %v3416_v12  ;;  %v3483_v16 = vsel %vm3368_vm3, %v6826_v10, 0.0 }
 0x3c5   : > { %v3413_v17 = vpop.xlane.xlu0 %3412  ;;  %3484 = vadd.xlane.f32.xlu0 %v3483_v16 }
 0x3c6   : > { %6195 = vpow2.f32 %v3457_v14  ;;  %v3463_v18 = vmul.f32 1.442695, %v3432_v58  ;;  %v3431_v61 = vsub.f32 %v6778_v2, %v3413_v17 }
 0x3c7   : > { %v6832_v60 = vpop.eup %6185 }
 0x3c8   : > { %6197 = vpow2.f32 %v3463_v18  ;;  %v3461_v19 = vmul.f32 1.442695, %v3431_v61  ;;  %v3492_v20 = vsel %vm3368_vm3, %v6832_v60, 0.0 }
 0x3c9   : > { %v6836_v62 = vpop.eup %6187  ;;  %3493 = vadd.xlane.f32.xlu1 %v3492_v20  ;;  %v4194_v20 = vld [vmem:[%s6365_s25 + $0x4] sm:$0xf] }
 0x3ca   : > { %6199 = vpow2.f32 %v3461_v19  ;;  %v3489_v0 = vsel %vm3368_vm3, %v6836_v62, 0.0 }
 0x3cb   : > { %v6840_v21 = vpop.eup %6189  ;;  %3490 = vadd.xlane.f32.xlu0 %v3489_v0  ;;  %v4196_v0 = vld [vmem:[%s6365_s25 + $0xc] sm:$0xf] }
 0x3cc   : > { %v3498_v2 = vsel %vm3368_vm3, %v6840_v21, 0.0 }
 0x3cd   : > { %v6844_v22 = vpop.eup %6191  ;;  %3499 = vadd.xlane.f32.xlu1 %v3498_v2 }
 0x3ce   : > { %v3495_v63 = vsel %vm3368_vm3, %v6844_v22, 0.0 }
 0x3cf   : > { %3496 = vadd.xlane.f32.xlu0 %v3495_v63 }
 0x3d1   : > { %v6848_v23 = vpop.eup %6193 }
 0x3d2   : > { %v3504_v24 = vsel %vm3368_vm3, %v6848_v23, 0.0 }
 0x3d3   : > { %v6852_v1 = vpop.eup %6195  ;;  %3505 = vadd.xlane.f32.xlu1 %v3504_v24  ;;  %v4198_v24 = vld [vmem:[%s6365_s25 + $0x14] sm:$0xf] }
 0x3d4   : > { %v3501_v27 = vsel %vm3368_vm3, %v6852_v1, 0.0 }
 0x3d5   : > { %v6856_v11 = vpop.eup %6197  ;;  %3502 = vadd.xlane.f32.xlu0 %v3501_v27 }
 0x3d6   : > { %v3510_v13 = vsel %vm3368_vm3, %v6856_v11, 0.0 }
 0x3d7   : > { %v6860_v32 = vpop.eup %6199  ;;  %3511 = vadd.xlane.f32.xlu1 %v3510_v13 }
 0x3d8   : > { %v3507_v41 = vsel %vm3368_vm3, %v6860_v32, 0.0 }
 0x3d9   : > { %3508 = vadd.xlane.f32.xlu0 %v3507_v41  ;;  %v4200_v41 = vld [vmem:[%s6365_s25 + $0x1c] sm:$0xf] }
 0x43e   : > { %v3470_v15 = vpop.xlane.xlu1 %3469 }
 0x43f   : > { %6201 = vrcp.f32 %v3470_v15 }
 0x440   : > { %v3467_v36 = vpop.xlane.xlu0 %3466 }
 0x441   : > { %6203 = vrcp.f32 %v3467_v36 }
 0x442   : > { %v3476_v37 = vpop.xlane.xlu1 %3475 }
 0x443   : > { %6205 = vrcp.f32 %v3476_v37 }
 0x444   : > { %v3473_v50 = vpop.xlane.xlu0 %3472 }
 0x445   : > { %6207 = vrcp.f32 %v3473_v50 }
 0x448   : > { %v3482_v53 = vpop.xlane.xlu1 %3481 }
 0x449   : > { %6209 = vrcp.f32 %v3482_v53 }
 0x44a   : > { %v3479_v54 = vpop.xlane.xlu0 %3478 }
 0x44b   : > { %6211 = vrcp.f32 %v3479_v54 }
 0x44c   : > { %v3488_v26 = vpop.xlane.xlu1 %3487  ;;  %v6202_v55 = vpop.eup %6201 }
 0x44d   : > { %6213 = vrcp.f32 %v3488_v26  ;;  %v3516_v3 = vmul.f32 %v6202_v55, %v6792_v25 }
 0x44e   : > { %v6204_v56 = vpop.eup %6203  ;;  %v3485_v59 = vpop.xlane.xlu0 %3484 }
 0x44f   : > { %6215 = vrcp.f32 %v3485_v59  ;;  %v3514_v28 = vmul.f32 %v6204_v56, %v6796_v30 }
 0x450   : > { %v6206_v4 = vpop.eup %6205 }
 0x451   : > { %6035 = vmatprep.mubr.msk.f32.mxu0 %vm3368_vm3, %v3514_v28  ;;  %v3520_v8 = vmul.f32 %v6206_v4, %v6801_v33 }
 0x452   : > { %v6208_v52 = vpop.eup %6207  ;;  %v3494_v29 = vpop.xlane.xlu1 %3493  ;;  %6036 = vmatmul.mubr.msk.f32.vlgmr.msra.gmra.mxu0 %vm3368_vm3, %v3516_v3 }
 0x453   : > { %6039 = vmatpush3.msra.mxu0 %v6668_v34  ;;  %v3518_v6 = vmul.f32 %v6208_v52, %v6806_v51  ;;  %6217 = vrcp.f32 %v3494_v29 }
 0x454   : > { %v3491_v31 = vpop.xlane.xlu0 %3490  ;;  %6040 = vmatprep.subr.mxu0 %v6671_v35 }
 0x455   : > { %6219 = vrcp.f32 %v3491_v31  ;;  %6041 = vmatpush3.msra.mxu0 %v6671_v35  ;;  %6042 = vmatprep.mubr.msk.f32.mxu0 %vm3368_vm3, %v3518_v6 }
 0x456   : > { %v3500_v25 = vpop.xlane.xlu1 %3499  ;;  %6045 = vmatprep.subr.mxu0 %v6676_v40  ;;  %6043 = vmatmul.mubr.msk.f32.vlgmr.msra.gmra.mxu0 %vm3368_vm3, %v3520_v8  ;;  %v6210_v30 = vpop.eup %6209 }
 0x457   : > { %6046 = vmatpush3.msra.mxu0 %v6676_v40  ;;  %6221 = vrcp.f32 %v3500_v25  ;;  %v3524_v33 = vmul.f32 %v6210_v30, %v6812_v38 }
 0x458   : > { %v6212_v34 = vpop.eup %6211  ;;  %v3497_v51 = vpop.xlane.xlu0 %3496  ;;  %6047 = vmatprep.subr.mxu0 %v6678_v42 }
 0x459   : > { %6223 = vrcp.f32 %v3497_v51  ;;  %6048 = vmatpush3.msra.mxu0 %v6678_v42  ;;  %v3522_v35 = vmul.f32 %v6212_v34, %v6816_v5 }
 0x45a   : > { %6059 = vmatprep.subr.mxu0 %v6680_v43  ;;  %v6214_v9 = vpop.eup %6213 }
 0x45b   : > { %6049 = vmatprep.mubr.msk.f32.mxu0 %vm3368_vm3, %v3522_v35  ;;  %v3528_v42 = vmul.f32 %v6214_v9, %v6821_v7 }
 0x45c   : > { %v6216_v57 = vpop.eup %6215  ;;  %v3506_v12 = vpop.xlane.xlu1 %3505  ;;  %6050 = vmatmul.mubr.msk.f32.vlgmr.msra.gmra.mxu0 %vm3368_vm3, %v3524_v33 }
 0x45d   : > { %6060 = vmatpush3.msra.mxu0 %v6680_v43  ;;  %v3526_v40 = vmul.f32 %v6216_v57, %v6826_v10  ;;  %6225 = vrcp.f32 %v3506_v12 }
 0x45e   : > { %v3503_v14 = vpop.xlane.xlu0 %3502  ;;  %6061 = vmatprep.subr.mxu0 %v6682_v44 }
 0x45f   : > { %6227 = vrcp.f32 %v3503_v14  ;;  %6062 = vmatpush3.msra.mxu0 %v6682_v44  ;;  %6056 = vmatprep.mubr.msk.f32.mxu1 %vm3368_vm3, %v3526_v40 }
 0x460   : > { %v3512_v38 = vpop.xlane.xlu1 %3511  ;;  %6073 = vmatprep.subr.mxu0 %v6686_v46  ;;  %6057 = vmatmul.mubr.msk.f32.vlgmr.msra.gmra.mxu1 %vm3368_vm3, %v3528_v42  ;;  %v6218_v5 = vpop.eup %6217 }
 0x461   : > { %6067 = vmatpush3.msra.mxu1 %v6673_v39  ;;  %6229 = vrcp.f32 %v3512_v38  ;;  %v3532_v7 = vmul.f32 %v6218_v5, %v6832_v60 }
 0x462   : > { %v6220_v43 = vpop.eup %6219  ;;  %v3509_v10 = vpop.xlane.xlu0 %3508  ;;  %6068 = vmatprep.subr.mxu1 %v6684_v45 }
 0x463   : > { %6231 = vrcp.f32 %v3509_v10  ;;  %6069 = vmatpush3.msra.mxu1 %v6684_v45  ;;  %v3530_v44 = vmul.f32 %v6220_v43, %v6836_v62  ;;  %v4195_v62 = vld [vmem:[%s6365_s25 + $0x8] sm:$0xf] }
 0x464   : > { %6080 = vmatprep.subr.mxu1 %v6688_v47  ;;  %v6222_v58 = vpop.eup %6221 }
 0x465   : > { %6063 = vmatprep.mubr.msk.f32.mxu0 %vm3368_vm3, %v3530_v44  ;;  %v3536_v45 = vmul.f32 %v6222_v58, %v6840_v21 }
 0x466   : > { %v6224_v16 = vpop.eup %6223  ;;  %6064 = vmatmul.mubr.msk.f32.vlgmr.msra.gmra.mxu0 %vm3368_vm3, %v3532_v7 }
 0x467   : > { %6074 = vmatpush3.msra.mxu0 %v6686_v46  ;;  %v3534_v39 = vmul.f32 %v6224_v16, %v6844_v22  ;;  %v4197_v22 = vld [vmem:[%s6365_s25 + $0x10] sm:$0xf] }
 0x468   : > { %6075 = vmatprep.subr.mxu0 %v6690_v48 }
 0x469   : > { %6076 = vmatpush3.msra.mxu0 %v6690_v48  ;;  %6070 = vmatprep.mubr.msk.f32.mxu1 %vm3368_vm3, %v3534_v39 }
 0x46a   : > { %6071 = vmatmul.mubr.msk.f32.vlgmr.msra.gmra.mxu1 %vm3368_vm3, %v3536_v45  ;;  %v6226_v17 = vpop.eup %6225 }
 0x46b   : > { %6081 = vmatpush3.msra.mxu1 %v6688_v47  ;;  %v3540_v61 = vmul.f32 %v6226_v17, %v6848_v23 }
 0x46c   : > { %v6228_v18 = vpop.eup %6227  ;;  %6082 = vmatprep.subr.mxu1 %v6692_v49 }
 0x46d   : > { %6083 = vmatpush3.msra.mxu1 %v6692_v49  ;;  %v3538_v46 = vmul.f32 %v6228_v18, %v6852_v1  ;;  %v4193_v49 = vld [vmem:[%s6365_s25] sm:$0xf] }
 0x46e   : > { %v6230_v48 = vpop.eup %6229  ;;  %6087 = vmatprep.subr.msk.mxu0 %vm4207_vm4, %v4193_v49  ;;  %6092 = vmatprep.subr.msk.mxu1 %vm4207_vm4, %v4194_v20 }
 0x46f   : > { %6077 = vmatprep.mubr.msk.f32.mxu0 %vm3368_vm3, %v3538_v46  ;;  %v3544_v19 = vmul.f32 %v6230_v48, %v6856_v11  ;;  %v4199_v11 = vld [vmem:[%s6365_s25 + $0x18] sm:$0xf] }
 0x470   : > { %v6232_v60 = vpop.eup %6231  ;;  %6078 = vmatmul.mubr.msk.f32.vlgmr.msra.gmra.mxu0 %vm3368_vm3, %v3540_v61 }
 0x471   : > { %v3542_v47 = vmul.f32 %v6232_v60, %v6860_v32  ;;  %6088 = vmatpush3.msk.msra.mxu0 %vm4207_vm4, %v4193_v49 }
 0x472   : > { %6097 = vmatprep.subr.msk.mxu0 %vm4207_vm4, %v4195_v62 }
 0x473   : > { %6084 = vmatprep.mubr.msk.f32.mxu1 %vm3368_vm3, %v3542_v47 }
 0x474   : > { %6085 = vmatmul.mubr.msk.f32.vlgmr.msra.gmra.mxu1 %vm3368_vm3, %v3544_v19 }
 0x475   : > { %6093 = vmatpush3.msk.msra.mxu1 %vm4207_vm4, %v4194_v20 }
 0x476   : > { %6102 = vmatprep.subr.msk.mxu1 %vm4207_vm4, %v4196_v0 }
 0x512   : > { %v6037_v21 = vpop.f32.mrf.mxu0 }
 0x514   : > { %v3617_v2 = vpop.f32.mrf.mxu0 }
 0x515   : > { %6089 = vmatprep.mubr.msk.f32.mxu0 %vm2637_vm2, %v3617_v2  ;;  %v5446_v2 = vld [vmem:[%s7079_s7] ss:$0 sm:$0xff] }
 0x516   : > { %v6044_v63 = vpop.f32.mrf.mxu0  ;;  %6090 = vmatmul.mubr.msk.f32.vlgmr.msra.gmra.mxu0 %vm2637_vm2, %v6037_v21 }
 0x517   : > { %6098 = vmatpush3.msk.msra.mxu0 %vm4207_vm4, %v4195_v62 }
 0x518   : > { %v3698_v23 = vpop.f32.mrf.mxu0  ;;  %6107 = vmatprep.subr.msk.mxu0 %vm4207_vm4, %v4197_v22 }
 0x519   : > { %6094 = vmatprep.mubr.msk.f32.mxu1 %vm2637_vm2, %v3698_v23 }
 0x51a   : > { %6095 = vmatmul.mubr.msk.f32.vlgmr.msra.gmra.mxu1 %vm2637_vm2, %v6044_v63 }
 0x51b   : > { %6103 = vmatpush3.msk.msra.mxu1 %vm4207_vm4, %v4196_v0 }
 0x51c   : > { %v6051_v1 = vpop.f32.mrf.mxu0  ;;  %6112 = vmatprep.subr.msk.mxu1 %vm4207_vm4, %v4198_v24 }
 0x51e   : > { %v3779_v27 = vpop.f32.mrf.mxu0 }
 0x51f   : > { %6099 = vmatprep.mubr.msk.f32.mxu0 %vm2637_vm2, %v3779_v27 }
 0x520   : > { %v6058_v13 = vpop.f32.mrf.mxu1  ;;  %6100 = vmatmul.mubr.msk.f32.vlgmr.msra.gmra.mxu0 %vm2637_vm2, %v6051_v1 }
 0x521   : > { %6108 = vmatpush3.msk.msra.mxu0 %vm4207_vm4, %v4197_v22  ;;  %v6237_v22 = vld [vmem:[#allocation2 + $0x8] sm:$0xff] }
 0x522   : > { %v3860_v32 = vpop.f32.mrf.mxu1  ;;  %6117 = vmatprep.subr.msk.mxu0 %vm4207_vm4, %v4199_v11 }
 0x523   : > { %6104 = vmatprep.mubr.msk.f32.mxu1 %vm2637_vm2, %v3860_v32 }
 0x524   : > { %6105 = vmatmul.mubr.msk.f32.vlgmr.msra.gmra.mxu1 %vm2637_vm2, %v6058_v13 }
 0x525   : > { %6113 = vmatpush3.msk.msra.mxu1 %vm4207_vm4, %v4198_v24  ;;  %v6238_v24 = vld [vmem:[#allocation2] sm:$0xff] }
 0x526   : > { %v6065_v15 = vpop.f32.mrf.mxu0  ;;  %6122 = vmatprep.subr.msk.mxu1 %vm4207_vm4, %v4200_v41 }
 0x528   : > { %v3941_v36 = vpop.f32.mrf.mxu0 }
 0x529   : > { %6109 = vmatprep.mubr.msk.f32.mxu0 %vm2637_vm2, %v3941_v36 }
 0x52a   : > { %v6072_v37 = vpop.f32.mrf.mxu1  ;;  %6110 = vmatmul.mubr.msk.f32.vlgmr.msra.gmra.mxu0 %vm2637_vm2, %v6065_v15 }
 0x52b   : > { %6118 = vmatpush3.msk.msra.mxu0 %vm4207_vm4, %v4199_v11 }
 0x52c   : > { %v4022_v50 = vpop.f32.mrf.mxu1 }
 0x52d   : > { %6114 = vmatprep.mubr.msk.f32.mxu1 %vm2637_vm2, %v4022_v50 }
 0x52e   : > { %6115 = vmatmul.mubr.msk.f32.vlgmr.msra.gmra.mxu1 %vm2637_vm2, %v6072_v37 }
 0x52f   : > { %6123 = vmatpush3.msk.msra.mxu1 %vm4207_vm4, %v4200_v41 }
 0x530   : > { %v6079_v53 = vpop.f32.mrf.mxu0 }
 0x532   : > { %v4103_v54 = vpop.f32.mrf.mxu0 }
 0x533   : > { %6119 = vmatprep.mubr.msk.f32.mxu0 %vm2637_vm2, %v4103_v54 }
 0x534   : > { %v6086_v26 = vpop.f32.mrf.mxu1  ;;  %6120 = vmatmul.mubr.msk.f32.vlgmr.msra.gmra.mxu0 %vm2637_vm2, %v6079_v53 }
 0x536   : > { %v4184_v55 = vpop.f32.mrf.mxu1 }
 0x537   : > { %6124 = vmatprep.mubr.msk.f32.mxu1 %vm2637_vm2, %v4184_v55 }
 0x538   : > { %6125 = vmatmul.mubr.msk.f32.vlgmr.msra.gmra.mxu1 %vm2637_vm2, %v6086_v26 }
 0x5d6   : > { %v6091_v56 = vpop.f32.mrf.mxu0 }
 0x5d7   : > { %v4889_v25 = vsel %vm691_vm1, %v6091_v56, 0.0 }
 0x5d8   : > { %v4277_v28 = vpop.f32.mrf.mxu0 }
 0x5d9   : > { %v4874_v33 = vsel %vm691_vm1, %v4277_v28, 0.0  ;;  %v4961_v28 = vld [vmem:[%s6382_s27 + $0x10] sm:$0xff] }
 0x5da   : > { %v6096_v59 = vpop.f32.mrf.mxu1 }
 0x5db   : > { %v4890_v6 = vsel %vm691_vm1, %v6096_v59, 0.0  ;;  %v4962_v59 = vld [vmem:[%s6382_s27 + $0x18] sm:$0xff] }
 0x5dc   : > { %v4361_v3 = vpop.f32.mrf.mxu1  ;;  %v4891_v51 = vadd.f32 %v4890_v6, %v4889_v25  ;;  %6127 = vmatprep.subr.mxu0 %v4962_v59  ;;  %v5058_v6 = vld [vmem:[%s6392_s29 + $0x28] sm:$0xff] }
 0x5dd   : > { %v4875_v30 = vsel %vm691_vm1, %v4361_v3, 0.0  ;;  %6128 = vmatpush3.msra.mxu0 %v4962_v59  ;;  %v4960_v3 = vld [vmem:[%s6382_s27 + $0x8] sm:$0xff] }
 0x5de   : > { %v4876_v12 = vadd.f32 %v4875_v30, %v4874_v33  ;;  %6129 = vmatprep.subr.mxu0 %v4961_v28 }
 0x5df   : > { %6130 = vmatpush3.msra.mxu0 %v4961_v28 }
 0x5e0   : > { %v6101_v4 = vpop.f32.mrf.mxu0  ;;  %6131 = vmatprep.subr.mxu0 %v4960_v3 }
 0x5e1   : > { %v4892_v34 = vsel %vm691_vm1, %v6101_v4, 0.0  ;;  %v4959_v4 = vld [vmem:[%s6382_s27] sm:$0xff]  ;;  %6132 = vmatpush3.msra.mxu0 %v4960_v3 }
 0x5e2   : > { %v4445_v29 = vpop.f32.mrf.mxu0  ;;  %v4893_v40 = vadd.f32 %v4892_v34, %v4891_v51  ;;  %6133 = vmatprep.subr.mxu0 %v4959_v4 }
 0x5e3   : > { %v4877_v9 = vsel %vm691_vm1, %v4445_v29, 0.0  ;;  %6134 = vmatpush3.msra.mxu0 %v4959_v4  ;;  %v5059_v29 = vld [vmem:[%s6392_s29 + $0x30] sm:$0xff] }
 0x5e4   : > { %v6106_v52 = vpop.f32.mrf.mxu1  ;;  %v4878_v5 = vadd.f32 %v4877_v9, %v4876_v12  ;;  %v5447_v9 = vld [vmem:[%s658_s17] ss:$0 sm:$0xff] }
 0x5e5   : > { %v4894_v57 = vsel %vm691_vm1, %v6106_v52, 0.0  ;;  %v5060_v52 = vld [vmem:[%s6392_s29 + $0x38] sm:$0xff] }
 0x5e6   : > { %v4529_v31 = vpop.f32.mrf.mxu1  ;;  %v4895_v43 = vadd.f32 %v4894_v57, %v4893_v40  ;;  %6138 = vmatprep.subr.mxu1 %v5060_v52 }
 0x5e7   : > { %v4879_v42 = vsel %vm691_vm1, %v4529_v31, 0.0  ;;  %6139 = vmatpush3.msra.mxu1 %v5060_v52  ;;  %v5057_v31 = vld [vmem:[%s6392_s29 + $0x20] sm:$0xff] }
 0x5e8   : > { %v4880_v58 = vadd.f32 %v4879_v42, %v4878_v5  ;;  %6140 = vmatprep.subr.mxu1 %v5059_v29  ;;  %v5448_v42 = vld [vmem:[%s661_s22] ss:$0 sm:$0xff] }
 0x5e9   : > { %6141 = vmatpush3.msra.mxu1 %v5059_v29 }
 0x5ea   : > { %v6111_v8 = vpop.f32.mrf.mxu0  ;;  %6142 = vmatprep.subr.mxu1 %v5058_v6 }
 0x5eb   : > { %v4896_v38 = vsel %vm691_vm1, %v6111_v8, 0.0  ;;  %6143 = vmatpush3.msra.mxu1 %v5058_v6 }
 0x5ec   : > { %v4613_v14 = vpop.f32.mrf.mxu0  ;;  %v4897_v16 = vadd.f32 %v4896_v38, %v4895_v43  ;;  %6144 = vmatprep.subr.mxu1 %v5057_v31 }
 0x5ed   : > { %v4881_v44 = vsel %vm691_vm1, %v4613_v14, 0.0  ;;  %6145 = vmatpush3.msra.mxu1 %v5057_v31 }
 0x5ee   : > { %v6116_v35 = vpop.f32.mrf.mxu1  ;;  %v4882_v18 = vadd.f32 %v4881_v44, %v4880_v58  ;;  %v5055_v44 = vld [vmem:[%s6392_s29 + $0x10] sm:$0xff]  ;;  %v5053_v58 = vld [vmem:[%s6392_s29] sm:$0xff] }
 0x5ef   : > { %v4898_v7 = vsel %vm691_vm1, %v6116_v35, 0.0 }
 0x5f0   : > { %v4697_v10 = vpop.f32.mrf.mxu1  ;;  %v4899_v46 = vadd.f32 %v4898_v7, %v4897_v16  ;;  %v5054_v7 = vld [vmem:[%s6392_s29 + $0x8] sm:$0xff]  ;;  %v5449_v16 = vld [vmem:[%s669_s6] ss:$0 sm:$0xff] }
 0x5f1   : > { %v4883_v45 = vsel %vm691_vm1, %v4697_v10, 0.0  ;;  %v5056_v10 = vld [vmem:[%s6392_s29 + $0x18] sm:$0xff] }
 0x5f2   : > { %v4884_v60 = vadd.f32 %v4883_v45, %v4882_v18  ;;  %6146 = vmatprep.subr.mxu1 %v5056_v10 }
 0x5f3   : > { %6147 = vmatpush3.msra.mxu1 %v5056_v10 }
 0x5f4   : > { %v6121_v39 = vpop.f32.mrf.mxu0  ;;  %6148 = vmatprep.subr.mxu1 %v5055_v44 }
 0x5f5   : > { %v4900_v17 = vsel %vm691_vm1, %v6121_v39, 0.0  ;;  %6149 = vmatpush3.msra.mxu1 %v5055_v44 }
 0x5f6   : > { %v4781_v61 = vpop.f32.mrf.mxu0  ;;  %v4901_v47 = vadd.f32 %v4900_v17, %v4899_v46  ;;  %6150 = vmatprep.subr.mxu1 %v5054_v7 }
 0x5f7   : > { %v4885_v48 = vsel %vm691_vm1, %v4781_v61, 0.0  ;;  %6151 = vmatpush3.msra.mxu1 %v5054_v7 }
 0x5f8   : > { %v6126_v19 = vpop.f32.mrf.mxu1  ;;  %v4886_v20 = vadd.f32 %v4885_v48, %v4884_v60  ;;  %6152 = vmatprep.subr.mxu1 %v5053_v58  ;;  %v5452_v48 = vld [vmem:[%s677_s5] ss:$0 sm:$0xff] }
 0x5f9   : > { %v4902_v49 = vsel %vm691_vm1, %v6126_v19, 0.0  ;;  %6153 = vmatpush3.msra.mxu1 %v5053_v58 }
 0x5fa   : > { %v4903_v62 = vadd.f32 %v4902_v49, %v4901_v47  ;;  %v4865_v0 = vpop.f32.mrf.mxu1 }
 0x5fb   : > { %v4887_v21 = vsel %vm691_vm1, %v4865_v0, 0.0 }
 0x5fc   : > { %v4905_v63 = vadd.f32 %v6237_v22, %v4903_v62  ;;  %v4888_v23 = vadd.f32 %v4887_v21, %v4886_v20 }
 0x5fe   : > { %v4904_v1 = vadd.f32 %v6238_v24, %v4888_v23  ;;  %v6979_v27 = vadd.f32 %v5446_v2, %v4905_v63 }
 0x600   : > { %v4920_v11 = vsel %vm691_vm1, %v6979_v27, 0.0  ;;  %v6983_v13 = vadd.f32 %v5446_v2, %v4904_v1 }
 0x601   : > { %4921 = vadd.xlane.f32.xlu1 %v4920_v11 }
 0x602   : > { %v4917_v32 = vsel %vm691_vm1, %v6983_v13, 0.0 }
 0x603   : > { %4918 = vadd.xlane.f32.xlu0 %v4917_v32 }
 0x68a   : > { %v4922_v41 = vpop.xlane.xlu1 %4921 }
 0x68b   : > { %v4924_v15 = vmul.f32 0.03125, %v4922_v41 }
 0x68c   : > { %v4919_v36 = vpop.xlane.xlu0 %4918 }
 0x68d   : > { %v4926_v37 = vsub.f32 %v6979_v27, %v4924_v15  ;;  %v4923_v50 = vmul.f32 0.03125, %v4919_v36 }
 0x68f   : > { %v4925_v53 = vsub.f32 %v6983_v13, %v4923_v50  ;;  %v4928_v54 = vmul.f32 %v4926_v37, %v4926_v37 }
 0x691   : > { %v4932_v26 = vsel %vm691_vm1, %v4928_v54, 0.0  ;;  %v4927_v55 = vmul.f32 %v4925_v53, %v4925_v53 }
 0x692   : > { %4933 = vadd.xlane.f32.xlu1 %v4932_v26 }
 0x693   : > { %v4929_v56 = vsel %vm691_vm1, %v4927_v55, 0.0 }
 0x694   : > { %4930 = vadd.xlane.f32.xlu0 %v4929_v56 }
 0x71b   : > { %v4934_v8 = vpop.xlane.xlu1 %4933 }
 0x71c   : > { %v4936_v25 = vmul.f32 0.03125, %v4934_v8 }
 0x71d   : > { %v4931_v30 = vpop.xlane.xlu0 %4930 }
 0x71e   : > { %v4938_v34 = vadd.f32 1e-05, %v4936_v25  ;;  %v4935_v51 = vmul.f32 0.03125, %v4931_v30 }
 0x720   : > { %6233 = vrsqrt.f32 %v4938_v34  ;;  %v4937_v35 = vadd.f32 1e-05, %v4935_v51 }
 0x722   : > { %6235 = vrsqrt.f32 %v4937_v35 }
 0x72d   : > { %v6234_v33 = vpop.eup %6233 }
 0x72e   : > { %v4942_v57 = vmul.f32 %v6234_v33, %v4926_v37 }
 0x72f   : > { %v6236_v12 = vpop.eup %6235 }
 0x730   : > { %v4941_v40 = vmul.f32 %v6236_v12, %v4925_v53  ;;  %v4950_v14 = vmul.f32 %v5447_v9, %v4942_v57 }
 0x732   : > { %v4949_v38 = vmul.f32 %v5447_v9, %v4941_v40  ;;  %v4958_v43 = vadd.f32 %v5448_v42, %v4950_v14 }
 0x734   : > { %v4957_v5 = vadd.f32 %v5448_v42, %v4949_v38 }
 0x736   : > { %6135 = vmatprep.mubr.msk.f32.mxu0 %vm691_vm1, %v4957_v5 }
 0x737   : > { %6136 = vmatmul.mubr.msk.f32.vlgmr.msra.gmra.mxu0 %vm691_vm1, %v4958_v43 }
 0x7f7   : > { %v6137_v39 = vpop.f32.mrf.mxu0 }
 0x7f8   : > { %v5048_v45 = vadd.f32 %v6137_v39, %v5449_v16 }
 0x7f9   : > { %v5042_v17 = vpop.f32.mrf.mxu0 }
 0x7fa   : > { %v5043_v18 = vadd.f32 %v5449_v16, %v5042_v17  ;;  %v5052_v61 = vmax.f32 %v5048_v45, 0.0 }
 0x7fc   : > { %v5051_v46 = vmax.f32 %v5043_v18, 0.0 }
 0x7fe   : > { %6154 = vmatprep.mubr.msk.f32.mxu1 %vm5068_vm5, %v5051_v46 }
 0x7ff   : > { %6155 = vmatmul.mubr.msk.f32.vlgmr.msra.gmra.mxu1 %vm5068_vm5, %v5052_v61 }
 0x8bf   : > { %v6156_v60 = vpop.f32.mrf.mxu1 }
 0x8c0   : > { %v5147_v47 = vadd.f32 %v6156_v60, %v5452_v48 }
 0x8c1   : > { %v5141_v19 = vpop.f32.mrf.mxu1 }
 0x8c2   : > { %v5151_v49 = vadd.f32 %v5147_v47, %v6979_v27  ;;  %v5142_v20 = vadd.f32 %v5452_v48, %v5141_v19 }
 0x8c4   : > { %5153 = vst.msk [vmem:[#allocation2 + $0x8] sm:$0xff] %vm691_vm1, %v5151_v49  ;;  %5155 = vst.msk [vmem:[%s7080_s4 + $0x8] sm:$0xff] %vm691_vm1, %v5151_v49  ;;  %v5150_v62 = vadd.f32 %v5142_v20, %v6983_v13 }
 0x8c6   : > { %5152 = vst.msk [vmem:[#allocation2] sm:$0xff] %vm691_vm1, %v5150_v62  ;;  %5154 = vst.msk [vmem:[%s7080_s4] sm:$0xff] %vm691_vm1, %v5150_v62 }
 0x8c7 PF: > { %s7081_s30 = sld [smem:[#allocation3_spill]] }
 0x8cd   : > { %s25_s18 = sadd.s32 1, %s7081_s30  }
 0x8ce   : > { %p22_p5 = scmp.ge.s32.totalorder %s25_s18, 4  }
 0x8d0   :  { %24 = sbr.rel (!%p22_p5) target bundleno = 8 (0x8), region = 146 }

</bundles_post_ra>
